<compile_context>
chip_gen: v6e
topology: v6e:2x2x1
jax: 0.10.0
libtpu: 0.0.40
codegen_flags: <defaults>
</compile_context>

<pallas_src>
import functools

import jax
import jax.numpy as jnp
from jax import lax
from jax.experimental import pallas as pl
from jax.experimental.pallas import tpu as pltpu


def _round_up(x, m):
    return ((x + m - 1) // m) * m


def _activation(y, activation, prelu_a):
    if activation == "HS":            # Hardswish
        return y * jnp.clip(y + 3.0, 0.0, 6.0) * (1.0 / 6.0)
    if activation == "PRE":           # PReLU (scalar slope)
        return jnp.where(y >= 0.0, y, prelu_a * y)
    if activation is None:            # module: skip activation
        return y
    return jnp.maximum(y, 0.0)        # 'RE' -> ReLU (module default)


# --------------------------------------------------------------------------------------
# Fused direct-conv kernel (stride == 1)
# --------------------------------------------------------------------------------------
def _direct_conv_kernel(x_ref, w_ref, b_ref, o_ref, acc_ref, *,
                        KH, KW, Wp, dil, TM, activation, prelu_a):
    # x_ref:   (L, Cin_pad)        flattened padded image of this batch element (resident)
    # w_ref:   (KH*KW, Cin_pad, TN) BN-scale-folded weights for this Cout tile
    # b_ref:   (1, TN)              folded BN bias (f32)
    # o_ref:   (TM, TN)             output tile (padded-width output coordinates)
    # acc_ref: (TM, TN)             f32 accumulator scratch
    m = pl.program_id(2)
    base = m * TM

    # fold the BN bias into the accumulator init (saves an epilogue VPU pass)
    acc_ref[...] = jnp.broadcast_to(b_ref[...], acc_ref.shape)

    for ki in range(KH):
        for kj in range(KW):
            off = base + dil * (ki * Wp + kj)
            xv = x_ref[pl.ds(off, TM), :]             # (TM, Cin_pad) shifted slab
            wv = w_ref[ki * KW + kj]                  # (Cin_pad, TN)
            acc_ref[...] += jnp.dot(xv, wv, preferred_element_type=jnp.float32)

    o_ref[...] = _activation(acc_ref[...], activation, prelu_a).astype(o_ref.dtype)


def _conv_bn_act_fused_stride1(x_nchw, weight_oihw, scale, bias, *,
                               dilation, pad, OH, OW, activation, prelu_a, compute_dtype):
    N, Cin, H, W = x_nchw.shape
    Cout, _, KH, KW = weight_oihw.shape
    cdt = jnp.dtype(compute_dtype) if compute_dtype is not None else jnp.dtype(x_nchw.dtype)
    itemsize = cdt.itemsize
    cin_mult = max(8, 32 // itemsize)                 # sublane packing for the weight operand

    Hp, Wp = H + 2 * pad, W + 2 * pad
    Cin_pad = _round_up(Cin, cin_mult)

    # NHWC, spatial zero-pad, zero-pad channels, flatten (Hp, Wp) -> Hp*Wp   (single pass)
    x_nhwc = jnp.transpose(x_nchw, (0, 2, 3, 1))
    x_padded = jnp.pad(x_nhwc, ((0, 0), (pad, pad), (pad, pad), (0, Cin_pad - Cin))).astype(cdt)
    x_flat = x_padded.reshape(N, Hp * Wp, Cin_pad)

    # M axis = padded-width output coordinates (OW..Wp-1 columns are discarded afterwards)
    M_im = OH * Wp
    TM = min(1024, _round_up(M_im, 16))               # 16: legal for f32 and bf16 sublanes
    M_pad = _round_up(M_im, TM)
    halo = dilation * ((KH - 1) * Wp + (KW - 1))      # largest shift used by the kernel taps
    L = _round_up(M_pad + halo, 16)
    x_flat = jnp.pad(x_flat, ((0, 0), (0, L - Hp * Wp), (0, 0)))

    cout128 = _round_up(Cout, 128)                    # lane-dense output stores
    TN = min(512, cout128)
    Cout_pad = _round_up(cout128, TN)

    # weights OIHW -> (KH, KW, Cin, Cout), fold BN scale, pad, flatten taps
    w_khwc = jnp.transpose(weight_oihw, (2, 3, 1, 0)).astype(jnp.float32) * scale[None, None, None, :]
    w_khwc = jnp.pad(w_khwc, ((0, 0), (0, 0), (0, Cin_pad - Cin), (0, Cout_pad - Cout)))
    w_mat = w_khwc.reshape(KH * KW, Cin_pad, Cout_pad).astype(cdt)
    bias_p = jnp.pad(bias.reshape(1, Cout).astype(jnp.float32), ((0, 0), (0, Cout_pad - Cout)))

    n_n = Cout_pad // TN
    n_m = M_pad // TM

    kernel = functools.partial(
        _direct_conv_kernel, KH=KH, KW=KW, Wp=Wp, dil=dilation, TM=TM,
        activation=activation, prelu_a=float(prelu_a))

    out_itemsize = jnp.dtype(x_nchw.dtype).itemsize
    cost = pl.CostEstimate(
        flops=2 * N * M_pad * KH * KW * Cin_pad * Cout_pad,
        transcendentals=0,
        bytes_accessed=int(x_flat.size * itemsize + w_mat.size * itemsize
                           + N * M_pad * Cout_pad * out_itemsize),
    )

    out_flat = pl.pallas_call(
        kernel,
        out_shape=jax.ShapeDtypeStruct((N, M_pad, Cout_pad), x_nchw.dtype),
        grid_spec=pltpu.PrefetchScalarGridSpec(
            num_scalar_prefetch=0,
            grid=(N, n_n, n_m),
            in_specs=[
                # whole padded image of batch element n stays resident across (j, m)
                pl.BlockSpec((None, L, Cin_pad), lambda n, j, m: (n, 0, 0)),
                # folded weights: re-DMA'd only when the Cout tile changes
                pl.BlockSpec((KH * KW, Cin_pad, TN), lambda n, j, m: (0, 0, j)),
                pl.BlockSpec((1, TN), lambda n, j, m: (0, j)),
            ],
            out_specs=pl.BlockSpec((None, TM, TN), lambda n, j, m: (n, m, j)),
            scratch_shapes=[pltpu.VMEM((TM, TN), jnp.float32)],
        ),
        compiler_params=pltpu.CompilerParams(
            # reduction is fully internal -> every axis independent (megacore-shardable)
            dimension_semantics=("parallel", "parallel", "parallel"),
            vmem_limit_bytes=32 * 1024 * 1024,   # safe on v5e/v6e/v7x; working set << limit
        ),
        cost_estimate=cost,
    )(x_flat, w_mat, bias_p)

    # (N, M_pad, Cout_pad) -> (N, OH, Wp, Cout) -> drop garbage columns -> NCHW
    out = out_flat[:, :OH * Wp, :Cout].reshape(N, OH, Wp, Cout)[:, :, :OW, :]
    return jnp.transpose(out, (0, 3, 1, 2))


# --------------------------------------------------------------------------------------
# Fallback: tiled im2col GEMM (stride > 1) — previously validated path
# --------------------------------------------------------------------------------------
def _im2col_gemm_kernel(p_ref, w_ref, bias_ref, o_ref, acc_ref, *, activation, prelu_a):
    k = pl.program_id(2)

    @pl.when(k == 0)
    def _():
        acc_ref[...] = jnp.zeros_like(acc_ref)

    acc_ref[...] += jnp.dot(p_ref[...], w_ref[...], preferred_element_type=jnp.float32)

    @pl.when(k == pl.num_programs(2) - 1)
    def _():
        y = acc_ref[...] + bias_ref[...]
        o_ref[...] = _activation(y, activation, prelu_a).astype(o_ref.dtype)


def _conv_bn_act_im2col(x_nchw, weight_oihw, scale, bias, *,
                        stride, dilation, pad, OH, OW, activation, prelu_a):
    N, Cin, H, W = x_nchw.shape
    Cout, _, KH, KW = weight_oihw.shape

    x_nhwc = jnp.transpose(x_nchw, (0, 2, 3, 1))
    x_pad = jnp.pad(x_nhwc, ((0, 0), (pad, pad), (pad, pad), (0, 0)))
    cols = []
    for ki in range(KH):
        for kj in range(KW):
            i0 = ki * dilation
            j0 = kj * dilation
            cols.append(
                x_pad[:, i0:i0 + (OH - 1) * stride + 1:stride,
                         j0:j0 + (OW - 1) * stride + 1:stride, :])
    patches = jnp.stack(cols, axis=3).reshape(N * OH * OW, KH * KW * Cin)
    M, K = patches.shape

    w_mat = jnp.transpose(weight_oihw, (2, 3, 1, 0)).reshape(K, Cout).astype(jnp.float32)
    bias2 = bias.reshape(1, Cout).astype(jnp.float32)
    w_scaled = (w_mat * scale[None, :]).astype(patches.dtype)

    TM = min(512, _round_up(M, 8))
    TK = min(512, _round_up(K, 128))
    cout128 = _round_up(Cout, 128)
    TN = min(512, cout128)

    M_pad = _round_up(M, TM)
    K_pad = _round_up(K, TK)
    Cout_pad = _round_up(cout128, TN)

    patches_p = jnp.pad(patches, ((0, M_pad - M), (0, K_pad - K)))
    w_p = jnp.pad(w_scaled, ((0, K_pad - K), (0, Cout_pad - Cout)))
    bias_p = jnp.pad(bias2, ((0, 0), (0, Cout_pad - Cout)))

    kernel = functools.partial(_im2col_gemm_kernel, activation=activation,
                               prelu_a=float(prelu_a))

    out_flat = pl.pallas_call(
        kernel,
        out_shape=jax.ShapeDtypeStruct((M_pad, Cout_pad), x_nchw.dtype),
        grid_spec=pltpu.PrefetchScalarGridSpec(
            num_scalar_prefetch=0,
            grid=(M_pad // TM, Cout_pad // TN, K_pad // TK),
            in_specs=[
                pl.BlockSpec((TM, TK), lambda i, j, k: (i, k)),
                pl.BlockSpec((TK, TN), lambda i, j, k: (k, j)),
                pl.BlockSpec((1, TN), lambda i, j, k: (0, j)),
            ],
            out_specs=pl.BlockSpec((TM, TN), lambda i, j, k: (i, j)),
            scratch_shapes=[pltpu.VMEM((TM, TN), jnp.float32)],
        ),
        compiler_params=pltpu.CompilerParams(
            dimension_semantics=("parallel", "parallel", "arbitrary"),
            vmem_limit_bytes=32 * 1024 * 1024,
        ),
    )(patches_p, w_p, bias_p)

    out = out_flat[:M, :Cout].reshape(N, OH, OW, Cout)
    return jnp.transpose(out, (0, 3, 1, 2))


# --------------------------------------------------------------------------------------
# Public wrapper
# --------------------------------------------------------------------------------------
def conv2d_bn_activation(
    x_nchw,                      # (N, Cin, H, W)
    weight_oihw,                 # (Cout, Cin, KH, KW)
    gamma, beta,                 # (Cout,)
    running_mean, running_var,   # (Cout,)
    *,
    stride=1,
    dilation=1,
    groups=1,
    eps=0.01,
    activation="RE",
    prelu_a=0.25,                # nn.PReLU() default init
    compute_dtype=None,          # e.g. jnp.bfloat16 for MXU-peak matmul (f32 accumulation)
):
    N, Cin, H, W = x_nchw.shape
    Cout, Cin_w, KH, KW = weight_oihw.shape
    assert groups == 1, "groups != 1 not supported"                 # TODO(synk)
    assert Cin == Cin_w
    assert KH == KW, "module passes a single (square) kernel_size"
    pad = (KH - 1) // 2 * dilation

    OH = (H + 2 * pad - dilation * (KH - 1) - 1) // stride + 1
    OW = (W + 2 * pad - dilation * (KW - 1) - 1) // stride + 1

    # fold BatchNorm (eval mode / running stats)
    scale = gamma / jnp.sqrt(running_var + eps)                      # (Cout,)
    bias = beta - running_mean * scale                               # (Cout,)

    if stride == 1:
        return _conv_bn_act_fused_stride1(
            x_nchw, weight_oihw, scale, bias,
            dilation=dilation, pad=pad, OH=OH, OW=OW,
            activation=activation, prelu_a=prelu_a, compute_dtype=compute_dtype)

    # TODO(synk): stride > 1 falls back to a materialized-im2col GEMM (f32 compute).
    return _conv_bn_act_im2col(
        x_nchw, weight_oihw, scale, bias,
        stride=stride, dilation=dilation, pad=pad, OH=OH, OW=OW,
        activation=activation, prelu_a=prelu_a)


# --------------------------------------------------------------------------------------
# Reference + self-test
# --------------------------------------------------------------------------------------
def _reference(x, w, gamma, beta, mean, var, *, stride, dilation, eps, activation,
               prelu_a=0.25):
    pad = (w.shape[2] - 1) // 2 * dilation
    y = lax.conv_general_dilated(
        x, w,
        window_strides=(stride, stride),
        padding=((pad, pad), (pad, pad)),
        rhs_dilation=(dilation, dilation),
        dimension_numbers=("NCHW", "OIHW", "NCHW"),
    )
    s = (gamma / jnp.sqrt(var + eps)).reshape(1, -1, 1, 1)
    b = (beta - mean * gamma / jnp.sqrt(var + eps)).reshape(1, -1, 1, 1)
    return _activation(y * s + b, activation, prelu_a)


if __name__ == "__main__":
    # small shapes consistent with the module: batch=2, Cin=4, Cout=8, 16x16 spatial
    N, Cin, Cout, H, W = 2, 4, 8, 16, 16
    KH = KW = 3
    eps = 0.01

    key = jax.random.PRNGKey(0)
    kx, kw, kg, kb, km, kv = jax.random.split(key, 6)
    x = jax.random.normal(kx, (N, Cin, H, W), dtype=jnp.float32)
    weight = jax.random.normal(kw, (Cout, Cin, KH, KW), dtype=jnp.float32) * 0.1
    gamma = 1.0 + 0.1 * jax.random.normal(kg, (Cout,), dtype=jnp.float32)
    beta = 0.1 * jax.random.normal(kb, (Cout,), dtype=jnp.float32)
    running_mean = 0.1 * jax.random.normal(km, (Cout,), dtype=jnp.float32)
    running_var = 1.0 + 0.1 * jax.random.uniform(kv, (Cout,), dtype=jnp.float32)

    def check(name, out, ref, atol, rtol):
        out = jax.block_until_ready(out)
        assert out.shape == ref.shape, (name, out.shape, ref.shape)
        err = float(jnp.max(jnp.abs(out - ref)))
        assert jnp.allclose(out, ref, atol=atol, rtol=rtol), (name, err)

    cases = [
        ("relu_s1",    dict(stride=1, dilation=1, activation="RE")),   # fused path
        ("hswish_s1",  dict(stride=1, dilation=1, activation="HS")),   # fused path
        ("prelu_s1",   dict(stride=1, dilation=1, activation="PRE")),  # fused path
        ("relu_s1_d2", dict(stride=1, dilation=2, activation="RE")),   # fused, dilated
        ("relu_s2",    dict(stride=2, dilation=1, activation="RE")),   # im2col fallback
    ]
    for name, cfg in cases:
        out = conv2d_bn_activation(x, weight, gamma, beta, running_mean, running_var,
                                   eps=eps, **cfg)
        ref = _reference(x, weight, gamma, beta, running_mean, running_var, eps=eps, **cfg)
        check(name, out, ref, atol=1e-4, rtol=1e-4)

    # bf16 compute (f32 accumulation) — looser numerical tolerance
    out = conv2d_bn_activation(x, weight, gamma, beta, running_mean, running_var,
                               eps=eps, stride=1, dilation=1, activation="RE",
                               compute_dtype=jnp.bfloat16)
    ref = _reference(x, weight, gamma, beta, running_mean, running_var, eps=eps,
                     stride=1, dilation=1, activation="RE")
    check("relu_s1_bf16", out, ref, atol=5e-2, rtol=5e-2)

    print("KERNEL_OK")
</pallas_src>

<mosaic_0001>
module attributes {stable_mosaic.version = 11 : i64} {
  func.func @_direct_conv_kernel(%arg0: i32, %arg1: i32, %arg2: i32, %arg3: memref<1x336x8xf32, #tpu.memory_space<vmem>>, %arg4: memref<9x8x128xf32, #tpu.memory_space<vmem>>, %arg5: memref<1x128xf32, #tpu.memory_space<vmem>>, %arg6: memref<1x288x128xf32, #tpu.memory_space<vmem>>, %arg7: memref<288x128xf32, #tpu.memory_space<vmem>>) attributes {dimension_semantics = [#tpu.dimension_semantics<parallel>, #tpu.dimension_semantics<parallel>, #tpu.dimension_semantics<parallel>], iteration_bounds = array<i64: 2, 1, 1>, scalar_prefetch = 0 : i64, scratch_operands = 1 : i64, tpu.core_type = #tpu.core_type<tc>, window_params = [{transform_indices = @transform_0, window_bounds = array<i64: 1, 336, 8>}, {transform_indices = @transform_1, window_bounds = array<i64: 9, 8, 128>}, {transform_indices = @transform_2, window_bounds = array<i64: 1, 128>}, {transform_indices = @transform_3, window_bounds = array<i64: 1, 288, 128>}]} {
    %c288_i32 = arith.constant 288 : i32
    %0 = arith.muli %arg2, %c288_i32 : i32
    %c0 = arith.constant 0 : index
    %c0_0 = arith.constant 0 : index
    %1 = vector.load %arg5[%c0, %c0_0] : memref<1x128xf32, #tpu.memory_space<vmem>>, vector<1x128xf32>
    %2 = vector.shape_cast %1 : vector<1x128xf32> to vector<1x128xf32>
    %3 = vector.broadcast %2 : vector<1x128xf32> to vector<288x128xf32>
    %c0_1 = arith.constant 0 : index
    %c0_2 = arith.constant 0 : index
    %4 = vector.load %arg7[%c0_1, %c0_2] : memref<288x128xf32, #tpu.memory_space<vmem>>, vector<288x128xf32>
    tpu.vector_store %arg7[%c0_1, %c0_2], %3 {strides = array<i32>} : memref<288x128xf32, #tpu.memory_space<vmem>>, vector<288x128xf32>,
    %c0_i32 = arith.constant 0 : i32
    %5 = arith.addi %0, %c0_i32 : i32
    %c0_3 = arith.constant 0 : index
    %6 = arith.index_cast %5 : i32 to index
    %c0_4 = arith.constant 0 : index
    %7 = vector.load %arg3[%c0_3, %6, %c0_4] : memref<1x336x8xf32, #tpu.memory_space<vmem>>, vector<1x288x8xf32>
    %8 = vector.shape_cast %7 : vector<1x288x8xf32> to vector<288x8xf32>
    %c0_5 = arith.constant 0 : index
    %c0_6 = arith.constant 0 : index
    %c0_7 = arith.constant 0 : index
    %9 = vector.load %arg4[%c0_5, %c0_6, %c0_7] : memref<9x8x128xf32, #tpu.memory_space<vmem>>, vector<1x8x128xf32>
    %10 = vector.shape_cast %9 : vector<1x8x128xf32> to vector<8x128xf32>
    %c0_8 = arith.constant 0 : index
    %c0_9 = arith.constant 0 : index
    %11 = vector.load %arg7[%c0_8, %c0_9] : memref<288x128xf32, #tpu.memory_space<vmem>>, vector<288x128xf32>
    %cst = arith.constant dense<0.000000e+00> : vector<288x128xf32>
    %12 = tpu.matmul %8, %10, %cst {dimension_numbers = #tpu.dot_dimension_numbers<[1], [0], [0], [1], [0, 0, 1, 1], [], []>} : vector<288x8xf32>, vector<8x128xf32>, vector<288x128xf32> -> vector<288x128xf32>
    %13 = arith.addf %11, %12 : vector<288x128xf32>
    %c0_10 = arith.constant 0 : index
    %c0_11 = arith.constant 0 : index
    %14 = vector.load %arg7[%c0_10, %c0_11] : memref<288x128xf32, #tpu.memory_space<vmem>>, vector<288x128xf32>
    tpu.vector_store %arg7[%c0_10, %c0_11], %13 {strides = array<i32>} : memref<288x128xf32, #tpu.memory_space<vmem>>, vector<288x128xf32>,
    %c1_i32 = arith.constant 1 : i32
    %15 = arith.addi %0, %c1_i32 : i32
    %c0_12 = arith.constant 0 : index
    %16 = arith.index_cast %15 : i32 to index
    %c0_13 = arith.constant 0 : index
    %17 = vector.load %arg3[%c0_12, %16, %c0_13] : memref<1x336x8xf32, #tpu.memory_space<vmem>>, vector<1x288x8xf32>
    %18 = vector.shape_cast %17 : vector<1x288x8xf32> to vector<288x8xf32>
    %c1 = arith.constant 1 : index
    %c0_14 = arith.constant 0 : index
    %c0_15 = arith.constant 0 : index
    %19 = vector.load %arg4[%c1, %c0_14, %c0_15] : memref<9x8x128xf32, #tpu.memory_space<vmem>>, vector<1x8x128xf32>
    %20 = vector.shape_cast %19 : vector<1x8x128xf32> to vector<8x128xf32>
    %c0_16 = arith.constant 0 : index
    %c0_17 = arith.constant 0 : index
    %21 = vector.load %arg7[%c0_16, %c0_17] : memref<288x128xf32, #tpu.memory_space<vmem>>, vector<288x128xf32>
    %cst_18 = arith.constant dense<0.000000e+00> : vector<288x128xf32>
    %22 = tpu.matmul %18, %20, %cst_18 {dimension_numbers = #tpu.dot_dimension_numbers<[1], [0], [0], [1], [0, 0, 1, 1], [], []>} : vector<288x8xf32>, vector<8x128xf32>, vector<288x128xf32> -> vector<288x128xf32>
    %23 = arith.addf %21, %22 : vector<288x128xf32>
    %c0_19 = arith.constant 0 : index
    %c0_20 = arith.constant 0 : index
    %24 = vector.load %arg7[%c0_19, %c0_20] : memref<288x128xf32, #tpu.memory_space<vmem>>, vector<288x128xf32>
    tpu.vector_store %arg7[%c0_19, %c0_20], %23 {strides = array<i32>} : memref<288x128xf32, #tpu.memory_space<vmem>>, vector<288x128xf32>,
    %c2_i32 = arith.constant 2 : i32
    %25 = arith.addi %0, %c2_i32 : i32
    %c0_21 = arith.constant 0 : index
    %26 = arith.index_cast %25 : i32 to index
    %c0_22 = arith.constant 0 : index
    %27 = vector.load %arg3[%c0_21, %26, %c0_22] : memref<1x336x8xf32, #tpu.memory_space<vmem>>, vector<1x288x8xf32>
    %28 = vector.shape_cast %27 : vector<1x288x8xf32> to vector<288x8xf32>
    %c2 = arith.constant 2 : index
    %c0_23 = arith.constant 0 : index
    %c0_24 = arith.constant 0 : index
    %29 = vector.load %arg4[%c2, %c0_23, %c0_24] : memref<9x8x128xf32, #tpu.memory_space<vmem>>, vector<1x8x128xf32>
    %30 = vector.shape_cast %29 : vector<1x8x128xf32> to vector<8x128xf32>
    %c0_25 = arith.constant 0 : index
    %c0_26 = arith.constant 0 : index
    %31 = vector.load %arg7[%c0_25, %c0_26] : memref<288x128xf32, #tpu.memory_space<vmem>>, vector<288x128xf32>
    %cst_27 = arith.constant dense<0.000000e+00> : vector<288x128xf32>
    %32 = tpu.matmul %28, %30, %cst_27 {dimension_numbers = #tpu.dot_dimension_numbers<[1], [0], [0], [1], [0, 0, 1, 1], [], []>} : vector<288x8xf32>, vector<8x128xf32>, vector<288x128xf32> -> vector<288x128xf32>
    %33 = arith.addf %31, %32 : vector<288x128xf32>
    %c0_28 = arith.constant 0 : index
    %c0_29 = arith.constant 0 : index
    %34 = vector.load %arg7[%c0_28, %c0_29] : memref<288x128xf32, #tpu.memory_space<vmem>>, vector<288x128xf32>
    tpu.vector_store %arg7[%c0_28, %c0_29], %33 {strides = array<i32>} : memref<288x128xf32, #tpu.memory_space<vmem>>, vector<288x128xf32>,
    %c18_i32 = arith.constant 18 : i32
    %35 = arith.addi %0, %c18_i32 : i32
    %c0_30 = arith.constant 0 : index
    %36 = arith.index_cast %35 : i32 to index
    %c0_31 = arith.constant 0 : index
    %37 = vector.load %arg3[%c0_30, %36, %c0_31] : memref<1x336x8xf32, #tpu.memory_space<vmem>>, vector<1x288x8xf32>
    %38 = vector.shape_cast %37 : vector<1x288x8xf32> to vector<288x8xf32>
    %c3 = arith.constant 3 : index
    %c0_32 = arith.constant 0 : index
    %c0_33 = arith.constant 0 : index
    %39 = vector.load %arg4[%c3, %c0_32, %c0_33] : memref<9x8x128xf32, #tpu.memory_space<vmem>>, vector<1x8x128xf32>
    %40 = vector.shape_cast %39 : vector<1x8x128xf32> to vector<8x128xf32>
    %c0_34 = arith.constant 0 : index
    %c0_35 = arith.constant 0 : index
    %41 = vector.load %arg7[%c0_34, %c0_35] : memref<288x128xf32, #tpu.memory_space<vmem>>, vector<288x128xf32>
    %cst_36 = arith.constant dense<0.000000e+00> : vector<288x128xf32>
    %42 = tpu.matmul %38, %40, %cst_36 {dimension_numbers = #tpu.dot_dimension_numbers<[1], [0], [0], [1], [0, 0, 1, 1], [], []>} : vector<288x8xf32>, vector<8x128xf32>, vector<288x128xf32> -> vector<288x128xf32>
    %43 = arith.addf %41, %42 : vector<288x128xf32>
    %c0_37 = arith.constant 0 : index
    %c0_38 = arith.constant 0 : index
    %44 = vector.load %arg7[%c0_37, %c0_38] : memref<288x128xf32, #tpu.memory_space<vmem>>, vector<288x128xf32>
    tpu.vector_store %arg7[%c0_37, %c0_38], %43 {strides = array<i32>} : memref<288x128xf32, #tpu.memory_space<vmem>>, vector<288x128xf32>,
    %c19_i32 = arith.constant 19 : i32
    %45 = arith.addi %0, %c19_i32 : i32
    %c0_39 = arith.constant 0 : index
    %46 = arith.index_cast %45 : i32 to index
    %c0_40 = arith.constant 0 : index
    %47 = vector.load %arg3[%c0_39, %46, %c0_40] : memref<1x336x8xf32, #tpu.memory_space<vmem>>, vector<1x288x8xf32>
    %48 = vector.shape_cast %47 : vector<1x288x8xf32> to vector<288x8xf32>
    %c4 = arith.constant 4 : index
    %c0_41 = arith.constant 0 : index
    %c0_42 = arith.constant 0 : index
    %49 = vector.load %arg4[%c4, %c0_41, %c0_42] : memref<9x8x128xf32, #tpu.memory_space<vmem>>, vector<1x8x128xf32>
    %50 = vector.shape_cast %49 : vector<1x8x128xf32> to vector<8x128xf32>
    %c0_43 = arith.constant 0 : index
    %c0_44 = arith.constant 0 : index
    %51 = vector.load %arg7[%c0_43, %c0_44] : memref<288x128xf32, #tpu.memory_space<vmem>>, vector<288x128xf32>
    %cst_45 = arith.constant dense<0.000000e+00> : vector<288x128xf32>
    %52 = tpu.matmul %48, %50, %cst_45 {dimension_numbers = #tpu.dot_dimension_numbers<[1], [0], [0], [1], [0, 0, 1, 1], [], []>} : vector<288x8xf32>, vector<8x128xf32>, vector<288x128xf32> -> vector<288x128xf32>
    %53 = arith.addf %51, %52 : vector<288x128xf32>
    %c0_46 = arith.constant 0 : index
    %c0_47 = arith.constant 0 : index
    %54 = vector.load %arg7[%c0_46, %c0_47] : memref<288x128xf32, #tpu.memory_space<vmem>>, vector<288x128xf32>
    tpu.vector_store %arg7[%c0_46, %c0_47], %53 {strides = array<i32>} : memref<288x128xf32, #tpu.memory_space<vmem>>, vector<288x128xf32>,
    %c20_i32 = arith.constant 20 : i32
    %55 = arith.addi %0, %c20_i32 : i32
    %c0_48 = arith.constant 0 : index
    %56 = arith.index_cast %55 : i32 to index
    %c0_49 = arith.constant 0 : index
    %57 = vector.load %arg3[%c0_48, %56, %c0_49] : memref<1x336x8xf32, #tpu.memory_space<vmem>>, vector<1x288x8xf32>
    %58 = vector.shape_cast %57 : vector<1x288x8xf32> to vector<288x8xf32>
    %c5 = arith.constant 5 : index
    %c0_50 = arith.constant 0 : index
    %c0_51 = arith.constant 0 : index
    %59 = vector.load %arg4[%c5, %c0_50, %c0_51] : memref<9x8x128xf32, #tpu.memory_space<vmem>>, vector<1x8x128xf32>
    %60 = vector.shape_cast %59 : vector<1x8x128xf32> to vector<8x128xf32>
    %c0_52 = arith.constant 0 : index
    %c0_53 = arith.constant 0 : index
    %61 = vector.load %arg7[%c0_52, %c0_53] : memref<288x128xf32, #tpu.memory_space<vmem>>, vector<288x128xf32>
    %cst_54 = arith.constant dense<0.000000e+00> : vector<288x128xf32>
    %62 = tpu.matmul %58, %60, %cst_54 {dimension_numbers = #tpu.dot_dimension_numbers<[1], [0], [0], [1], [0, 0, 1, 1], [], []>} : vector<288x8xf32>, vector<8x128xf32>, vector<288x128xf32> -> vector<288x128xf32>
    %63 = arith.addf %61, %62 : vector<288x128xf32>
    %c0_55 = arith.constant 0 : index
    %c0_56 = arith.constant 0 : index
    %64 = vector.load %arg7[%c0_55, %c0_56] : memref<288x128xf32, #tpu.memory_space<vmem>>, vector<288x128xf32>
    tpu.vector_store %arg7[%c0_55, %c0_56], %63 {strides = array<i32>} : memref<288x128xf32, #tpu.memory_space<vmem>>, vector<288x128xf32>,
    %c36_i32 = arith.constant 36 : i32
    %65 = arith.addi %0, %c36_i32 : i32
    %c0_57 = arith.constant 0 : index
    %66 = arith.index_cast %65 : i32 to index
    %c0_58 = arith.constant 0 : index
    %67 = vector.load %arg3[%c0_57, %66, %c0_58] : memref<1x336x8xf32, #tpu.memory_space<vmem>>, vector<1x288x8xf32>
    %68 = vector.shape_cast %67 : vector<1x288x8xf32> to vector<288x8xf32>
    %c6 = arith.constant 6 : index
    %c0_59 = arith.constant 0 : index
    %c0_60 = arith.constant 0 : index
    %69 = vector.load %arg4[%c6, %c0_59, %c0_60] : memref<9x8x128xf32, #tpu.memory_space<vmem>>, vector<1x8x128xf32>
    %70 = vector.shape_cast %69 : vector<1x8x128xf32> to vector<8x128xf32>
    %c0_61 = arith.constant 0 : index
    %c0_62 = arith.constant 0 : index
    %71 = vector.load %arg7[%c0_61, %c0_62] : memref<288x128xf32, #tpu.memory_space<vmem>>, vector<288x128xf32>
    %cst_63 = arith.constant dense<0.000000e+00> : vector<288x128xf32>
    %72 = tpu.matmul %68, %70, %cst_63 {dimension_numbers = #tpu.dot_dimension_numbers<[1], [0], [0], [1], [0, 0, 1, 1], [], []>} : vector<288x8xf32>, vector<8x128xf32>, vector<288x128xf32> -> vector<288x128xf32>
    %73 = arith.addf %71, %72 : vector<288x128xf32>
    %c0_64 = arith.constant 0 : index
    %c0_65 = arith.constant 0 : index
    %74 = vector.load %arg7[%c0_64, %c0_65] : memref<288x128xf32, #tpu.memory_space<vmem>>, vector<288x128xf32>
    tpu.vector_store %arg7[%c0_64, %c0_65], %73 {strides = array<i32>} : memref<288x128xf32, #tpu.memory_space<vmem>>, vector<288x128xf32>,
    %c37_i32 = arith.constant 37 : i32
    %75 = arith.addi %0, %c37_i32 : i32
    %c0_66 = arith.constant 0 : index
    %76 = arith.index_cast %75 : i32 to index
    %c0_67 = arith.constant 0 : index
    %77 = vector.load %arg3[%c0_66, %76, %c0_67] : memref<1x336x8xf32, #tpu.memory_space<vmem>>, vector<1x288x8xf32>
    %78 = vector.shape_cast %77 : vector<1x288x8xf32> to vector<288x8xf32>
    %c7 = arith.constant 7 : index
    %c0_68 = arith.constant 0 : index
    %c0_69 = arith.constant 0 : index
    %79 = vector.load %arg4[%c7, %c0_68, %c0_69] : memref<9x8x128xf32, #tpu.memory_space<vmem>>, vector<1x8x128xf32>
    %80 = vector.shape_cast %79 : vector<1x8x128xf32> to vector<8x128xf32>
    %c0_70 = arith.constant 0 : index
    %c0_71 = arith.constant 0 : index
    %81 = vector.load %arg7[%c0_70, %c0_71] : memref<288x128xf32, #tpu.memory_space<vmem>>, vector<288x128xf32>
    %cst_72 = arith.constant dense<0.000000e+00> : vector<288x128xf32>
    %82 = tpu.matmul %78, %80, %cst_72 {dimension_numbers = #tpu.dot_dimension_numbers<[1], [0], [0], [1], [0, 0, 1, 1], [], []>} : vector<288x8xf32>, vector<8x128xf32>, vector<288x128xf32> -> vector<288x128xf32>
    %83 = arith.addf %81, %82 : vector<288x128xf32>
    %c0_73 = arith.constant 0 : index
    %c0_74 = arith.constant 0 : index
    %84 = vector.load %arg7[%c0_73, %c0_74] : memref<288x128xf32, #tpu.memory_space<vmem>>, vector<288x128xf32>
    tpu.vector_store %arg7[%c0_73, %c0_74], %83 {strides = array<i32>} : memref<288x128xf32, #tpu.memory_space<vmem>>, vector<288x128xf32>,
    %c38_i32 = arith.constant 38 : i32
    %85 = arith.addi %0, %c38_i32 : i32
    %c0_75 = arith.constant 0 : index
    %86 = arith.index_cast %85 : i32 to index
    %c0_76 = arith.constant 0 : index
    %87 = vector.load %arg3[%c0_75, %86, %c0_76] : memref<1x336x8xf32, #tpu.memory_space<vmem>>, vector<1x288x8xf32>
    %88 = vector.shape_cast %87 : vector<1x288x8xf32> to vector<288x8xf32>
    %c8 = arith.constant 8 : index
    %c0_77 = arith.constant 0 : index
    %c0_78 = arith.constant 0 : index
    %89 = vector.load %arg4[%c8, %c0_77, %c0_78] : memref<9x8x128xf32, #tpu.memory_space<vmem>>, vector<1x8x128xf32>
    %90 = vector.shape_cast %89 : vector<1x8x128xf32> to vector<8x128xf32>
    %c0_79 = arith.constant 0 : index
    %c0_80 = arith.constant 0 : index
    %91 = vector.load %arg7[%c0_79, %c0_80] : memref<288x128xf32, #tpu.memory_space<vmem>>, vector<288x128xf32>
    %cst_81 = arith.constant dense<0.000000e+00> : vector<288x128xf32>
    %92 = tpu.matmul %88, %90, %cst_81 {dimension_numbers = #tpu.dot_dimension_numbers<[1], [0], [0], [1], [0, 0, 1, 1], [], []>} : vector<288x8xf32>, vector<8x128xf32>, vector<288x128xf32> -> vector<288x128xf32>
    %93 = arith.addf %91, %92 : vector<288x128xf32>
    %c0_82 = arith.constant 0 : index
    %c0_83 = arith.constant 0 : index
    %94 = vector.load %arg7[%c0_82, %c0_83] : memref<288x128xf32, #tpu.memory_space<vmem>>, vector<288x128xf32>
    tpu.vector_store %arg7[%c0_82, %c0_83], %93 {strides = array<i32>} : memref<288x128xf32, #tpu.memory_space<vmem>>, vector<288x128xf32>,
    %c0_84 = arith.constant 0 : index
    %c0_85 = arith.constant 0 : index
    %95 = vector.load %arg7[%c0_84, %c0_85] : memref<288x128xf32, #tpu.memory_space<vmem>>, vector<288x128xf32>
    %cst_86 = arith.constant 0.000000e+00 : f32
    %96 = vector.broadcast %cst_86 : f32 to vector<288x128xf32>
    %97 = arith.maximumf %95, %96 : vector<288x128xf32>
    %c0_87 = arith.constant 0 : index
    %c0_88 = arith.constant 0 : index
    %c0_89 = arith.constant 0 : index
    %98 = vector.load %arg6[%c0_87, %c0_88, %c0_89] : memref<1x288x128xf32, #tpu.memory_space<vmem>>, vector<1x288x128xf32>
    %99 = vector.shape_cast %98 : vector<1x288x128xf32> to vector<288x128xf32>
    %100 = vector.shape_cast %97 : vector<288x128xf32> to vector<1x288x128xf32>
    tpu.vector_store %arg6[%c0_87, %c0_88, %c0_89], %100 {strides = array<i32>} : memref<1x288x128xf32, #tpu.memory_space<vmem>>, vector<1x288x128xf32>,
    return
  }
  func.func @transform_0(%arg0: i32, %arg1: i32, %arg2: i32) -> (i32, i32, i32) {
    %c0_i32 = arith.constant 0 : i32
    %c0_i32_0 = arith.constant 0 : i32
    %c0_i32_1 = arith.constant 0 : i32
    return %arg0, %c0_i32, %c0_i32_0 : i32, i32, i32
  }
  func.func @transform_1(%arg0: i32, %arg1: i32, %arg2: i32) -> (i32, i32, i32) {
    %c0_i32 = arith.constant 0 : i32
    %c0_i32_0 = arith.constant 0 : i32
    %c0_i32_1 = arith.constant 0 : i32
    return %c0_i32, %c0_i32_0, %arg1 : i32, i32, i32
  }
  func.func @transform_2(%arg0: i32, %arg1: i32, %arg2: i32) -> (i32, i32) {
    %c0_i32 = arith.constant 0 : i32
    %c0_i32_0 = arith.constant 0 : i32
    return %c0_i32, %arg1 : i32, i32
  }
  func.func @transform_3(%arg0: i32, %arg1: i32, %arg2: i32) -> (i32, i32, i32) {
    %c0_i32 = arith.constant 0 : i32
    return %arg0, %arg2, %arg1 : i32, i32, i32
  }
}

</mosaic_0001>

<bundles_post_ra>
// kernel: tpu_custom_call.1
= control target key start
LH: loop header
LB: loop body
LE: loop exit
PB: predicated region body
PF: predicated region fallthrough
CT: control target
= control target key end

     0   :  { %8 = vsyncpa [#allocation4], 0  ;;  %s8062_s0 = inlined_call_operand.vmem [shape: f32[2,336,8], index: 0, kind: input, shape index: {}]   ;;  %s8063_s1 = inlined_call_operand.vmem [shape: f32[9,8,128], index: 1, kind: input, shape index: {}]   ;;  %s8064_s2 = inlined_call_operand.vmem [shape: f32[1,128], index: 2, kind: input, shape index: {}]   ;;  %s8065_s3 = inlined_call_operand.hbm [shape: f32[2,288,128], index: 3, kind: output, shape index: {}]  }
   0x1   :  { %10 = vsyncpa [#allocation4 + $0x1], 0  ;;  %s6663_s12 = smov 0   ;;  %s6665_s13 = smov 0  }
   0x2   :  { %s6667_s14 = smov 0   ;;  %s6669_s15 = smov 0  }
   0x3   :  { %s6671_s16 = smov 0   ;;  %s6673_s17 = smov 0  }
   0x4 LB: > { %s5031_s18 = sadd.s32 4294967295, %s6638_s17   ;;  %s5032_s19 = sadd.s32 4294967294, %s6638_s17   ;;  %s6638_s17 = sphi %s6673_s17, %s16_s17   ;;  %s6634_s16 = sphi %s6671_s16, %s8072_s16   ;;  %s6630_s15 = sphi %s6669_s15, %s8071_s15   ;;  %s6626_s14 = sphi %s6667_s14, %s8070_s14   ;;  %s6622_s13 = sphi %s6665_s13, %s8069_s13   ;;  %s6618_s12 = sphi %s6663_s12, %s8068_s12  }
   0x5   : > { %s35_s20 = sadd.s32 1, %s6634_s16  ;;  %s124_s21 = sadd.s32 1, %s6626_s14 }
   0x6   : > { %p37_p0 = scmp.ge.s32.totalorder %s35_s20, 2  ;;  %p134_p1 = scmp.ne.s32.totalorder %s6626_s14, %s6622_s13 }
   0x7   : > { %p135_p2 = scmp.eq.s32.totalorder %s5031_s18, 1  ;;  %p140_p3 = scmp.ne.s32.totalorder %s6622_s13, %s6618_s12 }
   0x8   : > { %s8074_s20 = smov (%p37_p0, %s35_s20), 0  ;;  %p141_p5 = scmp.eq.s32.totalorder %s5032_s19, 1 }
   0x9   : > { %p6703_p4 = por %p135_p2, %p134_p1  ;;  %s117_s23 = ssub.s32 %s6634_s16, %s8074_s20 }
   0xa   : > { %p5037_p6 = scmp.ge.s32.totalorder %s6638_s17, 1  ;;  %p122_p7 = scmp.eq.s32.totalorder %s117_s23, 0 }
   0xb   : > { %p6710_p8 = por %p141_p5, %p140_p3  ;;  %p180_p9 = scmp.lt.s32.totalorder %s6638_s17, 3 }
   0xc   : > { %s6716_s25 = scalar_select %p122_p7, %s6626_s14, %s124_s21  }
   0xd   : > { %p181_p10 = pnand %p5037_p6, %p180_p9 }
   0xe   : > { %p211_p11 = scmp.lt.s32.totalorder (!%p181_p10), %s6630_s15, 1  ;;  %s208_s7 = sand.u32 (!%p181_p10), 1, %s6622_s13  }
   0xf   : > { %184 = sbr.rel (%p181_p10) target bundleno = 562 (0x232), region = 32  ;;  %s6640_s26 = smov (!%p181_p10), [#allocation3]  }
  0x10   : > { %s6502_s8 = smul.u32 (!%p181_p10), 288, %s208_s7  ;;  %s6566_s27 = sshll.u32 (!%p181_p10), %s6640_s26, 4  ;;  %s6567_s27 = int_to_ptr.vmem [resolvable:$false] %s6566_s27 }
  0x11   : > { %s6504_s10 = smul.u32 (!%p181_p10), 4608, %s6630_s15  ;;  %s6568_s28 = scalar_lea.vmem (!%p181_p10), %s6567_s27, 9216 }
  0x13   : > { %s8009_s21 = scalar_lea.hbm (!%p181_p10), %s8065_s3, %s6504_s10 }
  0x14   : > { %v305_v0 = vld [vmem:[%s8063_s1] sm:$0xff]  ;;  %v5112_v1 = vld [vmem:[%s8063_s1 + $0x8] sm:$0xff]  ;;  %v5185_v2 = vld [vmem:[%s8063_s1 + $0x10] sm:$0xff]  ;;  %s212_s5 = scalar_select %p211_p11, %s6630_s15, 1  ;;  %vm342_vm0 = vcmask 64512  }
  0x15   : > { %6500 = vmatprep.subr.mxu1 %v305_v0  ;;  %5996 = vmatprep.subr.mxu0 %v305_v0  ;;  %v6747_v9 = vld [vmem:[%s8063_s1 + $0x18] sm:$0xff]  ;;  %v6752_v10 = vld [vmem:[%s8063_s1 + $0x20] sm:$0xff]  ;;  %v6833_v47 = vld [vmem:[%s8063_s1 + $0x28] sm:$0xff]  ;;  %s8017_s15 = scalar_lea.sflag [#allocation4], %s208_s7 }
  0x16   : > { %6501 = vmatpush3.msra.mxu1 %v305_v0  ;;  %5997 = vmatpush3.msra.mxu0 %v305_v0  ;;  %s6503_s6 = smul.u32 336, %s212_s5  ;;  %v6838_v48 = vld [vmem:[%s8063_s1 + $0x30] sm:$0xff] }
  0x17   : > { %6052 = vmatprep.subr.mxu1 %v5112_v1  ;;  %6108 = vmatprep.subr.mxu0 %v5185_v2 }
  0x18   : > { %s6732_s9 = scalar_lea.vmem %s8062_s0, %s6503_s6 }
  0x19   : > { %v269_v3 = vld [vmem:[%s6732_s9] sm:$0xff]  ;;  %v287_v4 = vld [vmem:[%s6732_s9 + $0x90] sm:$0xff]  ;;  %v270_v5 = vld [vmem:[%s6732_s9 + $0x8] sm:$0xff] }
  0x1a   : > { %5998 = vmatprep.mubr.msk.f32.mxu0 %vm342_vm0, %v269_v3  ;;  %6025 = vmatprep.mubr.msk.f32.mxu1 %vm342_vm0, %v287_v4  ;;  %v288_v6 = vld [vmem:[%s6732_s9 + $0x98] sm:$0xff]  ;;  %v271_v7 = vld [vmem:[%s6732_s9 + $0x10] sm:$0xff]  ;;  %v289_v8 = vld [vmem:[%s6732_s9 + $0xa0] sm:$0xff] }
  0x1b   : > { %5999 = vmatmul.mubr.msk.f32.vlgmr.msra.gmra.mxu0 %vm342_vm0, %v270_v5  ;;  %6026 = vmatmul.mubr.msk.f32.vlgmr.msra.gmra.mxu1 %vm342_vm0, %v288_v6  ;;  %v272_v11 = vld [vmem:[%s6732_s9 + $0x18] sm:$0xff]  ;;  %v290_v12 = vld [vmem:[%s6732_s9 + $0xa8] sm:$0xff]  ;;  %v273_v13 = vld [vmem:[%s6732_s9 + $0x20] sm:$0xff] }
  0x1c   : > { %6053 = vmatpush3.msra.mxu1 %v5112_v1  ;;  %6109 = vmatpush3.msra.mxu0 %v5185_v2  ;;  %v291_v14 = vld [vmem:[%s6732_s9 + $0xb0] sm:$0xff]  ;;  %v274_v15 = vld [vmem:[%s6732_s9 + $0x28] sm:$0xff]  ;;  %v292_v16 = vld [vmem:[%s6732_s9 + $0xb8] sm:$0xff] }
  0x1d   : > { %6001 = vmatprep.mubr.msk.f32.mxu0 %vm342_vm0, %v271_v7  ;;  %6028 = vmatprep.mubr.msk.f32.mxu1 %vm342_vm0, %v289_v8  ;;  %v275_v17 = vld [vmem:[%s6732_s9 + $0x30] sm:$0xff]  ;;  %v293_v18 = vld [vmem:[%s6732_s9 + $0xc0] sm:$0xff]  ;;  %v276_v19 = vld [vmem:[%s6732_s9 + $0x38] sm:$0xff] }
  0x1e   : > { %6164 = vmatprep.subr.mxu1 %v6747_v9  ;;  %6220 = vmatprep.subr.mxu0 %v6752_v10  ;;  %v294_v20 = vld [vmem:[%s6732_s9 + $0xc8] sm:$0xff]  ;;  %v277_v21 = vld [vmem:[%s6732_s9 + $0x40] sm:$0xff]  ;;  %v295_v22 = vld [vmem:[%s6732_s9 + $0xd0] sm:$0xff] }
  0x1f   : > { %6002 = vmatmul.mubr.msk.f32.gmra.mxu0 %vm342_vm0, %v272_v11  ;;  %6029 = vmatmul.mubr.msk.f32.gmra.mxu1 %vm342_vm0, %v290_v12  ;;  %v278_v23 = vld [vmem:[%s6732_s9 + $0x48] sm:$0xff]  ;;  %v296_v24 = vld [vmem:[%s6732_s9 + $0xd8] sm:$0xff]  ;;  %v279_v25 = vld [vmem:[%s6732_s9 + $0x50] sm:$0xff] }
  0x20   : > { %6004 = vmatprep.mubr.msk.f32.mxu0 %vm342_vm0, %v273_v13  ;;  %6031 = vmatprep.mubr.msk.f32.mxu1 %vm342_vm0, %v291_v14  ;;  %v297_v26 = vld [vmem:[%s6732_s9 + $0xe0] sm:$0xff]  ;;  %v280_v27 = vld [vmem:[%s6732_s9 + $0x58] sm:$0xff]  ;;  %v298_v28 = vld [vmem:[%s6732_s9 + $0xe8] sm:$0xff] }
  0x21   : > { %v281_v29 = vld [vmem:[%s6732_s9 + $0x60] sm:$0xff]  ;;  %v299_v30 = vld [vmem:[%s6732_s9 + $0xf0] sm:$0xff]  ;;  %v282_v31 = vld [vmem:[%s6732_s9 + $0x68] sm:$0xff] }
  0x22   : > { %v300_v32 = vld [vmem:[%s6732_s9 + $0xf8] sm:$0xff]  ;;  %v283_v33 = vld [vmem:[%s6732_s9 + $0x70] sm:$0xff]  ;;  %v301_v34 = vld [vmem:[%s6732_s9 + $0x100] sm:$0xff] }
  0x23   : > { %6005 = vmatmul.mubr.msk.f32.gmra.mxu0 %vm342_vm0, %v274_v15  ;;  %6032 = vmatmul.mubr.msk.f32.gmra.mxu1 %vm342_vm0, %v292_v16  ;;  %v284_v35 = vld [vmem:[%s6732_s9 + $0x78] sm:$0xff]  ;;  %v302_v36 = vld [vmem:[%s6732_s9 + $0x108] sm:$0xff]  ;;  %v285_v37 = vld [vmem:[%s6732_s9 + $0x80] sm:$0xff] }
  0x24   : > { %6007 = vmatprep.mubr.msk.f32.mxu0 %vm342_vm0, %v275_v17  ;;  %6034 = vmatprep.mubr.msk.f32.mxu1 %vm342_vm0, %v293_v18  ;;  %v303_v38 = vld [vmem:[%s6732_s9 + $0x110] sm:$0xff]  ;;  %v286_v39 = vld [vmem:[%s6732_s9 + $0x88] sm:$0xff]  ;;  %v304_v40 = vld [vmem:[%s6732_s9 + $0x118] sm:$0xff] }
  0x25   : > { %v5076_v41 = vld [vmem:[%s6732_s9 + $0x1] sm:$0xff]  ;;  %v5077_v43 = vld [vmem:[%s6732_s9 + $0x9] sm:$0xff]  ;;  %v5078_v45 = vld [vmem:[%s6732_s9 + $0x11] sm:$0xff] }
  0x26   : > { %v5149_v42 = vld [vmem:[%s6732_s9 + $0x2] sm:$0xff]  ;;  %v5150_v44 = vld [vmem:[%s6732_s9 + $0xa] sm:$0xff]  ;;  %v6826_v46 = vld [vmem:[%s6732_s9 + $0x12] sm:$0xff] }
  0x27   : > { %6008 = vmatmul.mubr.msk.f32.gmra.mxu0 %vm342_vm0, %v276_v19  ;;  %6035 = vmatmul.mubr.msk.f32.gmra.mxu1 %vm342_vm0, %v294_v20  ;;  %v5079_v49 = vld [vmem:[%s6732_s9 + $0x19] sm:$0xff]  ;;  %v5080_v51 = vld [vmem:[%s6732_s9 + $0x21] sm:$0xff]  ;;  %v5081_v53 = vld [vmem:[%s6732_s9 + $0x29] sm:$0xff] }
  0x28   : > { %6010 = vmatprep.mubr.msk.f32.mxu0 %vm342_vm0, %v277_v21  ;;  %6037 = vmatprep.mubr.msk.f32.mxu1 %vm342_vm0, %v295_v22  ;;  %v6844_v50 = vld [vmem:[%s6732_s9 + $0x1a] sm:$0xff]  ;;  %v6851_v52 = vld [vmem:[%s6732_s9 + $0x22] sm:$0xff]  ;;  %v6863_v54 = vld [vmem:[%s6732_s9 + $0x2a] sm:$0xff] }
  0x29   : > { %v5082_v55 = vld [vmem:[%s6732_s9 + $0x31] sm:$0xff]  ;;  %v5083_v57 = vld [vmem:[%s6732_s9 + $0x39] sm:$0xff]  ;;  %v5084_v59 = vld [vmem:[%s6732_s9 + $0x41] sm:$0xff] }
  0x2a   : > { %v6867_v56 = vld [vmem:[%s6732_s9 + $0x32] sm:$0xff]  ;;  %v6877_v58 = vld [vmem:[%s6732_s9 + $0x3a] sm:$0xff]  ;;  %v6881_v60 = vld [vmem:[%s6732_s9 + $0x42] sm:$0xff] }
  0x2b   : > { %6011 = vmatmul.mubr.msk.f32.gmra.mxu0 %vm342_vm0, %v278_v23  ;;  %6038 = vmatmul.mubr.msk.f32.gmra.mxu1 %vm342_vm0, %v296_v24  ;;  %v5085_v61 = vld [vmem:[%s6732_s9 + $0x49] sm:$0xff]  ;;  %v5086_v63 = vld [vmem:[%s6732_s9 + $0x51] sm:$0xff]  ;;  %v5087_v1 = vld [vmem:[%s6732_s9 + $0x59] sm:$0xff] }
  0x2c   : > { %6013 = vmatprep.mubr.msk.f32.mxu0 %vm342_vm0, %v279_v25  ;;  %6040 = vmatprep.mubr.msk.f32.mxu1 %vm342_vm0, %v297_v26  ;;  %v6891_v62 = vld [vmem:[%s6732_s9 + $0x4a] sm:$0xff]  ;;  %v6895_v0 = vld [vmem:[%s6732_s9 + $0x52] sm:$0xff]  ;;  %v6905_v2 = vld [vmem:[%s6732_s9 + $0x5a] sm:$0xff] }
  0x2d   : > { %v5088_v3 = vld [vmem:[%s6732_s9 + $0x61] sm:$0xff]  ;;  %v5089_v5 = vld [vmem:[%s6732_s9 + $0x69] sm:$0xff]  ;;  %v5090_v7 = vld [vmem:[%s6732_s9 + $0x71] sm:$0xff] }
  0x2e   : > { %v6909_v4 = vld [vmem:[%s6732_s9 + $0x62] sm:$0xff]  ;;  %v6919_v6 = vld [vmem:[%s6732_s9 + $0x6a] sm:$0xff]  ;;  %v6923_v8 = vld [vmem:[%s6732_s9 + $0x72] sm:$0xff] }
  0x2f   : > { %6014 = vmatmul.mubr.msk.f32.gmra.mxu0 %vm342_vm0, %v280_v27  ;;  %6041 = vmatmul.mubr.msk.f32.gmra.mxu1 %vm342_vm0, %v298_v28  ;;  %v5092_v11 = vld [vmem:[%s6732_s9 + $0x81] sm:$0xff]  ;;  %v5093_v13 = vld [vmem:[%s6732_s9 + $0x89] sm:$0xff]  ;;  %v5094_v15 = vld [vmem:[%s6732_s9 + $0x91] sm:$0xff] }
  0x30   : > { %6016 = vmatprep.mubr.msk.f32.mxu0 %vm342_vm0, %v281_v29  ;;  %6043 = vmatprep.mubr.msk.f32.mxu1 %vm342_vm0, %v299_v30  ;;  %v6937_v12 = vld [vmem:[%s6732_s9 + $0x82] sm:$0xff]  ;;  %v6947_v14 = vld [vmem:[%s6732_s9 + $0x8a] sm:$0xff]  ;;  %v6951_v16 = vld [vmem:[%s6732_s9 + $0x92] sm:$0xff] }
  0x31   : > { %v5095_v17 = vld [vmem:[%s6732_s9 + $0x99] sm:$0xff]  ;;  %v5096_v19 = vld [vmem:[%s6732_s9 + $0xa1] sm:$0xff]  ;;  %v5097_v21 = vld [vmem:[%s6732_s9 + $0xa9] sm:$0xff] }
  0x32   : > { %v6961_v18 = vld [vmem:[%s6732_s9 + $0x9a] sm:$0xff]  ;;  %v6965_v20 = vld [vmem:[%s6732_s9 + $0xa2] sm:$0xff]  ;;  %v6975_v22 = vld [vmem:[%s6732_s9 + $0xaa] sm:$0xff] }
  0x33   : > { %6017 = vmatmul.mubr.msk.f32.gmra.mxu0 %vm342_vm0, %v282_v31  ;;  %6044 = vmatmul.mubr.msk.f32.gmra.mxu1 %vm342_vm0, %v300_v32  ;;  %v5098_v23 = vld [vmem:[%s6732_s9 + $0xb1] sm:$0xff]  ;;  %v5099_v25 = vld [vmem:[%s6732_s9 + $0xb9] sm:$0xff]  ;;  %v5100_v27 = vld [vmem:[%s6732_s9 + $0xc1] sm:$0xff] }
  0x34   : > { %6019 = vmatprep.mubr.msk.f32.mxu0 %vm342_vm0, %v283_v33  ;;  %6046 = vmatprep.mubr.msk.f32.mxu1 %vm342_vm0, %v301_v34  ;;  %v6979_v24 = vld [vmem:[%s6732_s9 + $0xb2] sm:$0xff]  ;;  %v6989_v26 = vld [vmem:[%s6732_s9 + $0xba] sm:$0xff]  ;;  %v6993_v28 = vld [vmem:[%s6732_s9 + $0xc2] sm:$0xff] }
  0x35   : > { %v5101_v29 = vld [vmem:[%s6732_s9 + $0xc9] sm:$0xff]  ;;  %v5102_v31 = vld [vmem:[%s6732_s9 + $0xd1] sm:$0xff]  ;;  %v5103_v33 = vld [vmem:[%s6732_s9 + $0xd9] sm:$0xff] }
  0x36   : > { %v7003_v30 = vld [vmem:[%s6732_s9 + $0xca] sm:$0xff]  ;;  %v7007_v32 = vld [vmem:[%s6732_s9 + $0xd2] sm:$0xff]  ;;  %v7017_v34 = vld [vmem:[%s6732_s9 + $0xda] sm:$0xff] }
  0x37   : > { %6020 = vmatmul.mubr.msk.f32.gmra.mxu0 %vm342_vm0, %v284_v35  ;;  %6047 = vmatmul.mubr.msk.f32.gmra.mxu1 %vm342_vm0, %v302_v36  ;;  %v5104_v35 = vld [vmem:[%s6732_s9 + $0xe1] sm:$0xff] }
  0x38   : > { %6022 = vmatprep.mubr.msk.f32.mxu0 %vm342_vm0, %v285_v37  ;;  %6049 = vmatprep.mubr.msk.f32.mxu1 %vm342_vm0, %v303_v38  ;;  %v7021_v36 = vld [vmem:[%s6732_s9 + $0xe2] sm:$0xff]  ;;  %v7031_v38 = vld [vmem:[%s6732_s9 + $0xea] sm:$0xff] }
  0x39   : > { %v5105_v37 = vld [vmem:[%s6732_s9 + $0xe9] sm:$0xff] }
  0x3b   : > { %6023 = vmatmul.mubr.msk.f32.gmra.mxu0 %vm342_vm0, %v286_v39  ;;  %6050 = vmatmul.mubr.msk.f32.gmra.mxu1 %vm342_vm0, %v304_v40  ;;  %v5106_v39 = vld [vmem:[%s6732_s9 + $0xf1] sm:$0xff] }
  0x3c   : > { %6054 = vmatprep.mubr.msk.f32.mxu1 %vm342_vm0, %v5076_v41  ;;  %6110 = vmatprep.mubr.msk.f32.mxu0 %vm342_vm0, %v5149_v42  ;;  %v7035_v40 = vld [vmem:[%s6732_s9 + $0xf2] sm:$0xff]  ;;  %v7045_v42 = vld [vmem:[%s6732_s9 + $0xfa] sm:$0xff] }
  0x3d   : > { %v5107_v41 = vld [vmem:[%s6732_s9 + $0xf9] sm:$0xff] }
  0x3f   : > { %6055 = vmatmul.mubr.msk.f32.vlgmr.msra.gmra.mxu1 %vm342_vm0, %v5077_v43  ;;  %6111 = vmatmul.mubr.msk.f32.vlgmr.msra.gmra.mxu0 %vm342_vm0, %v5150_v44  ;;  %v5108_v43 = vld [vmem:[%s6732_s9 + $0x101] sm:$0xff] }
  0x40   : > { %6165 = vmatpush3.msra.mxu1 %v6747_v9  ;;  %6221 = vmatpush3.msra.mxu0 %v6752_v10  ;;  %v5091_v9 = vld [vmem:[%s6732_s9 + $0x79] sm:$0xff]  ;;  %v7049_v44 = vld [vmem:[%s6732_s9 + $0x102] sm:$0xff] }
  0x41   : > { %6057 = vmatprep.mubr.msk.f32.mxu1 %vm342_vm0, %v5078_v45  ;;  %6113 = vmatprep.mubr.msk.f32.mxu0 %vm342_vm0, %v6826_v46  ;;  %v6933_v10 = vld [vmem:[%s6732_s9 + $0x7a] sm:$0xff]  ;;  %v5109_v45 = vld [vmem:[%s6732_s9 + $0x109] sm:$0xff] }
  0x42   : > { %6276 = vmatprep.subr.mxu1 %v6833_v47  ;;  %6332 = vmatprep.subr.mxu0 %v6838_v48 }
  0x43   : > { %6058 = vmatmul.mubr.msk.f32.gmra.mxu1 %vm342_vm0, %v5079_v49  ;;  %6114 = vmatmul.mubr.msk.f32.gmra.mxu0 %vm342_vm0, %v6844_v50  ;;  %v7059_v49 = vld [vmem:[%s6732_s9 + $0x10a] sm:$0xff] }
  0x44   : > { %6060 = vmatprep.mubr.msk.f32.mxu1 %vm342_vm0, %v5080_v51  ;;  %6116 = vmatprep.mubr.msk.f32.mxu0 %vm342_vm0, %v6851_v52  ;;  %v5110_v51 = vld [vmem:[%s6732_s9 + $0x111] sm:$0xff] }
  0x47   : > { %6061 = vmatmul.mubr.msk.f32.gmra.mxu1 %vm342_vm0, %v5081_v53  ;;  %6117 = vmatmul.mubr.msk.f32.gmra.mxu0 %vm342_vm0, %v6863_v54  ;;  %v7063_v53 = vld [vmem:[%s6732_s9 + $0x112] sm:$0xff] }
  0x48   : > { %6063 = vmatprep.mubr.msk.f32.mxu1 %vm342_vm0, %v5082_v55  ;;  %6119 = vmatprep.mubr.msk.f32.mxu0 %vm342_vm0, %v6867_v56  ;;  %v5111_v55 = vld [vmem:[%s6732_s9 + $0x119] sm:$0xff] }
  0x4b   : > { %6064 = vmatmul.mubr.msk.f32.gmra.mxu1 %vm342_vm0, %v5083_v57  ;;  %6120 = vmatmul.mubr.msk.f32.gmra.mxu0 %vm342_vm0, %v6877_v58  ;;  %v7073_v57 = vld [vmem:[%s6732_s9 + $0x11a] sm:$0xff] }
  0x4c   : > { %6066 = vmatprep.mubr.msk.f32.mxu1 %vm342_vm0, %v5084_v59  ;;  %6122 = vmatprep.mubr.msk.f32.mxu0 %vm342_vm0, %v6881_v60  ;;  %v5295_v59 = vld [vmem:[%s6732_s9 + $0x13] sm:$0xff] }
  0x4f   : > { %6067 = vmatmul.mubr.msk.f32.gmra.mxu1 %vm342_vm0, %v5085_v61  ;;  %6123 = vmatmul.mubr.msk.f32.gmra.mxu0 %vm342_vm0, %v6891_v62  ;;  %v5296_v61 = vld [vmem:[%s6732_s9 + $0x1b] sm:$0xff] }
  0x50   : > { %6069 = vmatprep.mubr.msk.f32.mxu1 %vm342_vm0, %v5086_v63  ;;  %6125 = vmatprep.mubr.msk.f32.mxu0 %vm342_vm0, %v6895_v0  ;;  %v5297_v63 = vld [vmem:[%s6732_s9 + $0x23] sm:$0xff] }
  0x53   : > { %6070 = vmatmul.mubr.msk.f32.gmra.mxu1 %vm342_vm0, %v5087_v1  ;;  %6126 = vmatmul.mubr.msk.f32.gmra.mxu0 %vm342_vm0, %v6905_v2  ;;  %v7090_v1 = vld [vmem:[%s8063_s1 + $0x38] sm:$0xff] }
  0x54   : > { %6072 = vmatprep.mubr.msk.f32.mxu1 %vm342_vm0, %v5088_v3  ;;  %6128 = vmatprep.mubr.msk.f32.mxu0 %vm342_vm0, %v6909_v4  ;;  %v5298_v3 = vld [vmem:[%s6732_s9 + $0x2b] sm:$0xff] }
  0x57   : > { %6073 = vmatmul.mubr.msk.f32.gmra.mxu1 %vm342_vm0, %v5089_v5  ;;  %6129 = vmatmul.mubr.msk.f32.gmra.mxu0 %vm342_vm0, %v6919_v6  ;;  %v5311_v5 = vld [vmem:[%s6732_s9 + $0x93] sm:$0xff] }
  0x58   : > { %6075 = vmatprep.mubr.msk.f32.mxu1 %vm342_vm0, %v5090_v7  ;;  %6131 = vmatprep.mubr.msk.f32.mxu0 %vm342_vm0, %v6923_v8  ;;  %v5313_v7 = vld [vmem:[%s6732_s9 + $0xa3] sm:$0xff] }
  0x5b   : > { %6076 = vmatmul.mubr.msk.f32.gmra.mxu1 %vm342_vm0, %v5091_v9  ;;  %6132 = vmatmul.mubr.msk.f32.gmra.mxu0 %vm342_vm0, %v6933_v10  ;;  %v5315_v9 = vld [vmem:[%s6732_s9 + $0xb3] sm:$0xff] }
  0x5c   : > { %6078 = vmatprep.mubr.msk.f32.mxu1 %vm342_vm0, %v5092_v11  ;;  %6134 = vmatprep.mubr.msk.f32.mxu0 %vm342_vm0, %v6937_v12  ;;  %v5317_v11 = vld [vmem:[%s6732_s9 + $0xc3] sm:$0xff] }
  0x5f   : > { %6079 = vmatmul.mubr.msk.f32.gmra.mxu1 %vm342_vm0, %v5093_v13  ;;  %6135 = vmatmul.mubr.msk.f32.gmra.mxu0 %vm342_vm0, %v6947_v14  ;;  %v5319_v13 = vld [vmem:[%s6732_s9 + $0xd3] sm:$0xff] }
  0x60   : > { %6081 = vmatprep.mubr.msk.f32.mxu1 %vm342_vm0, %v5094_v15  ;;  %6137 = vmatprep.mubr.msk.f32.mxu0 %vm342_vm0, %v6951_v16  ;;  %v5321_v15 = vld [vmem:[%s6732_s9 + $0xe3] sm:$0xff] }
  0x63   : > { %6082 = vmatmul.mubr.msk.f32.gmra.mxu1 %vm342_vm0, %v5095_v17  ;;  %6138 = vmatmul.mubr.msk.f32.gmra.mxu0 %vm342_vm0, %v6961_v18  ;;  %v5323_v17 = vld [vmem:[%s6732_s9 + $0xf3] sm:$0xff] }
  0x64   : > { %6084 = vmatprep.mubr.msk.f32.mxu1 %vm342_vm0, %v5096_v19  ;;  %6140 = vmatprep.mubr.msk.f32.mxu0 %vm342_vm0, %v6965_v20  ;;  %v5325_v19 = vld [vmem:[%s6732_s9 + $0x103] sm:$0xff] }
  0x67   : > { %6085 = vmatmul.mubr.msk.f32.gmra.mxu1 %vm342_vm0, %v5097_v21  ;;  %6141 = vmatmul.mubr.msk.f32.gmra.mxu0 %vm342_vm0, %v6975_v22  ;;  %v5327_v21 = vld [vmem:[%s6732_s9 + $0x113] sm:$0xff] }
  0x68   : > { %6087 = vmatprep.mubr.msk.f32.mxu1 %vm342_vm0, %v5098_v23  ;;  %6143 = vmatprep.mubr.msk.f32.mxu0 %vm342_vm0, %v6979_v24  ;;  %v5256_v23 = vld [vmem:[%s6732_s9 + $0x122] sm:$0xff] }
  0x6b   : > { %6088 = vmatmul.mubr.msk.f32.gmra.mxu1 %vm342_vm0, %v5099_v25  ;;  %6144 = vmatmul.mubr.msk.f32.gmra.mxu0 %vm342_vm0, %v6989_v26  ;;  %v5257_v25 = vld [vmem:[%s6732_s9 + $0x12a] sm:$0xff] }
  0x6c   : > { %6090 = vmatprep.mubr.msk.f32.mxu1 %vm342_vm0, %v5100_v27  ;;  %6146 = vmatprep.mubr.msk.f32.mxu0 %vm342_vm0, %v6993_v28  ;;  %v5368_v27 = vld [vmem:[%s6732_s9 + $0x14] sm:$0xff] }
  0x6f   : > { %6091 = vmatmul.mubr.msk.f32.gmra.mxu1 %vm342_vm0, %v5101_v29  ;;  %6147 = vmatmul.mubr.msk.f32.gmra.mxu0 %vm342_vm0, %v7003_v30  ;;  %v5369_v29 = vld [vmem:[%s6732_s9 + $0x1c] sm:$0xff] }
  0x70   : > { %6093 = vmatprep.mubr.msk.f32.mxu1 %vm342_vm0, %v5102_v31  ;;  %6149 = vmatprep.mubr.msk.f32.mxu0 %vm342_vm0, %v7007_v32  ;;  %v5443_v31 = vld [vmem:[%s6732_s9 + $0x34] sm:$0xff] }
  0x73   : > { %6094 = vmatmul.mubr.msk.f32.gmra.mxu1 %vm342_vm0, %v5103_v33  ;;  %6150 = vmatmul.mubr.msk.f32.gmra.mxu0 %vm342_vm0, %v7017_v34  ;;  %v5445_v33 = vld [vmem:[%s6732_s9 + $0x44] sm:$0xff] }
  0x74   : > { %6096 = vmatprep.mubr.msk.f32.mxu1 %vm342_vm0, %v5104_v35  ;;  %6152 = vmatprep.mubr.msk.f32.mxu0 %vm342_vm0, %v7021_v36  ;;  %v5447_v35 = vld [vmem:[%s6732_s9 + $0x54] sm:$0xff] }
  0x77   : > { %6097 = vmatmul.mubr.msk.f32.gmra.mxu1 %vm342_vm0, %v5105_v37  ;;  %6153 = vmatmul.mubr.msk.f32.gmra.mxu0 %vm342_vm0, %v7031_v38  ;;  %v5449_v37 = vld [vmem:[%s6732_s9 + $0x64] sm:$0xff] }
  0x78   : > { %6099 = vmatprep.mubr.msk.f32.mxu1 %vm342_vm0, %v5106_v39  ;;  %6155 = vmatprep.mubr.msk.f32.mxu0 %vm342_vm0, %v7035_v40 }
  0x7b   : > { %6100 = vmatmul.mubr.msk.f32.gmra.mxu1 %vm342_vm0, %v5107_v41  ;;  %6156 = vmatmul.mubr.msk.f32.gmra.mxu0 %vm342_vm0, %v7045_v42 }
  0x7c   : > { %6102 = vmatprep.mubr.msk.f32.mxu1 %vm342_vm0, %v5108_v43  ;;  %6158 = vmatprep.mubr.msk.f32.mxu0 %vm342_vm0, %v7049_v44  ;;  %v5451_v43 = vld [vmem:[%s6732_s9 + $0x74] sm:$0xff] }
  0x7f   : > { %6103 = vmatmul.mubr.msk.f32.gmra.mxu1 %vm342_vm0, %v5109_v45  ;;  %6159 = vmatmul.mubr.msk.f32.gmra.mxu0 %vm342_vm0, %v7059_v49 }
  0x80   : > { %6105 = vmatprep.mubr.msk.f32.mxu1 %vm342_vm0, %v5110_v51  ;;  %6161 = vmatprep.mubr.msk.f32.mxu0 %vm342_vm0, %v7063_v53 }
  0x83   : > { %6106 = vmatmul.mubr.msk.f32.gmra.mxu1 %vm342_vm0, %v5111_v55  ;;  %6162 = vmatmul.mubr.msk.f32.gmra.mxu0 %vm342_vm0, %v7073_v57  ;;  %v5453_v55 = vld [vmem:[%s6732_s9 + $0x84] sm:$0xff] }
  0x84   : > { %6166 = vmatprep.mubr.msk.f32.mxu1 %vm342_vm0, %v6826_v46  ;;  %6222 = vmatprep.mubr.msk.f32.mxu0 %vm342_vm0, %v5295_v59  ;;  %v7095_v46 = vld [vmem:[%s8063_s1 + $0x40] sm:$0xff] }
  0x87   : > { %6167 = vmatmul.mubr.msk.f32.vlgmr.msra.gmra.mxu1 %vm342_vm0, %v6844_v50  ;;  %6223 = vmatmul.mubr.msk.f32.vlgmr.msra.gmra.mxu0 %vm342_vm0, %v5296_v61  ;;  %v5299_v50 = vld [vmem:[%s6732_s9 + $0x33] sm:$0xff] }
  0x88   : > { %6277 = vmatpush3.msra.mxu1 %v6833_v47  ;;  %6333 = vmatpush3.msra.mxu0 %v6838_v48  ;;  %v5300_v47 = vld [vmem:[%s6732_s9 + $0x3b] sm:$0xff]  ;;  %v5301_v48 = vld [vmem:[%s6732_s9 + $0x43] sm:$0xff]  ;;  %v5454_v61 = vld [vmem:[%s6732_s9 + $0x8c] sm:$0xff] }
  0x89   : > { %6169 = vmatprep.mubr.msk.f32.mxu1 %vm342_vm0, %v6851_v52  ;;  %6225 = vmatprep.mubr.msk.f32.mxu0 %vm342_vm0, %v5297_v63  ;;  %v5302_v52 = vld [vmem:[%s6732_s9 + $0x4b] sm:$0xff] }
  0x8a   : > { %6388 = vmatprep.subr.mxu1 %v7090_v1  ;;  %6444 = vmatprep.subr.mxu0 %v7095_v46 }
  0x8b   : > { %6170 = vmatmul.mubr.msk.f32.gmra.mxu1 %vm342_vm0, %v6863_v54  ;;  %6226 = vmatmul.mubr.msk.f32.gmra.mxu0 %vm342_vm0, %v5298_v3  ;;  %v5303_v54 = vld [vmem:[%s6732_s9 + $0x53] sm:$0xff] }
  0x8c   : > { %6172 = vmatprep.mubr.msk.f32.mxu1 %vm342_vm0, %v6867_v56  ;;  %6228 = vmatprep.mubr.msk.f32.mxu0 %vm342_vm0, %v5299_v50  ;;  %v5304_v56 = vld [vmem:[%s6732_s9 + $0x5b] sm:$0xff] }
  0x8f   : > { %6173 = vmatmul.mubr.msk.f32.gmra.mxu1 %vm342_vm0, %v6877_v58  ;;  %6229 = vmatmul.mubr.msk.f32.gmra.mxu0 %vm342_vm0, %v5300_v47  ;;  %v5305_v58 = vld [vmem:[%s6732_s9 + $0x63] sm:$0xff] }
  0x90   : > { %6175 = vmatprep.mubr.msk.f32.mxu1 %vm342_vm0, %v6881_v60  ;;  %6231 = vmatprep.mubr.msk.f32.mxu0 %vm342_vm0, %v5301_v48  ;;  %v5306_v60 = vld [vmem:[%s6732_s9 + $0x6b] sm:$0xff]  ;;  %v5456_v47 = vld [vmem:[%s6732_s9 + $0x9c] sm:$0xff] }
  0x93   : > { %6176 = vmatmul.mubr.msk.f32.gmra.mxu1 %vm342_vm0, %v6891_v62  ;;  %6232 = vmatmul.mubr.msk.f32.gmra.mxu0 %vm342_vm0, %v5302_v52  ;;  %v5307_v62 = vld [vmem:[%s6732_s9 + $0x73] sm:$0xff] }
  0x94   : > { %6178 = vmatprep.mubr.msk.f32.mxu1 %vm342_vm0, %v6895_v0  ;;  %6234 = vmatprep.mubr.msk.f32.mxu0 %vm342_vm0, %v5303_v54  ;;  %v5308_v0 = vld [vmem:[%s6732_s9 + $0x7b] sm:$0xff]  ;;  %v5457_v54 = vld [vmem:[%s6732_s9 + $0xa4] sm:$0xff] }
  0x97   : > { %6179 = vmatmul.mubr.msk.f32.gmra.mxu1 %vm342_vm0, %v6905_v2  ;;  %6235 = vmatmul.mubr.msk.f32.gmra.mxu0 %vm342_vm0, %v5304_v56  ;;  %v5309_v2 = vld [vmem:[%s6732_s9 + $0x83] sm:$0xff] }
  0x98   : > { %6181 = vmatprep.mubr.msk.f32.mxu1 %vm342_vm0, %v6909_v4  ;;  %6237 = vmatprep.mubr.msk.f32.mxu0 %vm342_vm0, %v5305_v58  ;;  %v5310_v4 = vld [vmem:[%s6732_s9 + $0x8b] sm:$0xff] }
  0x9b   : > { %6182 = vmatmul.mubr.msk.f32.gmra.mxu1 %vm342_vm0, %v6919_v6  ;;  %6238 = vmatmul.mubr.msk.f32.gmra.mxu0 %vm342_vm0, %v5306_v60  ;;  %v5312_v6 = vld [vmem:[%s6732_s9 + $0x9b] sm:$0xff]  ;;  %v5458_v60 = vld [vmem:[%s6732_s9 + $0xac] sm:$0xff] }
  0x9c   : > { %6184 = vmatprep.mubr.msk.f32.mxu1 %vm342_vm0, %v6923_v8  ;;  %6240 = vmatprep.mubr.msk.f32.mxu0 %vm342_vm0, %v5307_v62  ;;  %v5314_v8 = vld [vmem:[%s6732_s9 + $0xab] sm:$0xff] }
  0x9f   : > { %6185 = vmatmul.mubr.msk.f32.gmra.mxu1 %vm342_vm0, %v6933_v10  ;;  %6241 = vmatmul.mubr.msk.f32.gmra.mxu0 %vm342_vm0, %v5308_v0  ;;  %v5316_v10 = vld [vmem:[%s6732_s9 + $0xbb] sm:$0xff] }
  0xa0   : > { %6187 = vmatprep.mubr.msk.f32.mxu1 %vm342_vm0, %v6937_v12  ;;  %6243 = vmatprep.mubr.msk.f32.mxu0 %vm342_vm0, %v5309_v2  ;;  %v5318_v12 = vld [vmem:[%s6732_s9 + $0xcb] sm:$0xff]  ;;  %v5459_v2 = vld [vmem:[%s6732_s9 + $0xb4] sm:$0xff] }
  0xa3   : > { %6188 = vmatmul.mubr.msk.f32.gmra.mxu1 %vm342_vm0, %v6947_v14  ;;  %6244 = vmatmul.mubr.msk.f32.gmra.mxu0 %vm342_vm0, %v5310_v4  ;;  %v5320_v14 = vld [vmem:[%s6732_s9 + $0xdb] sm:$0xff] }
  0xa4   : > { %6190 = vmatprep.mubr.msk.f32.mxu1 %vm342_vm0, %v6951_v16  ;;  %6246 = vmatprep.mubr.msk.f32.mxu0 %vm342_vm0, %v5311_v5  ;;  %v5322_v16 = vld [vmem:[%s6732_s9 + $0xeb] sm:$0xff] }
  0xa7   : > { %6191 = vmatmul.mubr.msk.f32.gmra.mxu1 %vm342_vm0, %v6961_v18  ;;  %6247 = vmatmul.mubr.msk.f32.gmra.mxu0 %vm342_vm0, %v5312_v6  ;;  %v5324_v18 = vld [vmem:[%s6732_s9 + $0xfb] sm:$0xff] }
  0xa8   : > { %6193 = vmatprep.mubr.msk.f32.mxu1 %vm342_vm0, %v6965_v20  ;;  %6249 = vmatprep.mubr.msk.f32.mxu0 %vm342_vm0, %v5313_v7  ;;  %v5326_v20 = vld [vmem:[%s6732_s9 + $0x10b] sm:$0xff]  ;;  %v5460_v6 = vld [vmem:[%s6732_s9 + $0xbc] sm:$0xff] }
  0xab   : > { %6194 = vmatmul.mubr.msk.f32.gmra.mxu1 %vm342_vm0, %v6975_v22  ;;  %6250 = vmatmul.mubr.msk.f32.gmra.mxu0 %vm342_vm0, %v5314_v8  ;;  %v5328_v22 = vld [vmem:[%s6732_s9 + $0x11b] sm:$0xff] }
  0xac   : > { %6196 = vmatprep.mubr.msk.f32.mxu1 %vm342_vm0, %v6979_v24  ;;  %6252 = vmatprep.mubr.msk.f32.mxu0 %vm342_vm0, %v5315_v9  ;;  %v5329_v24 = vld [vmem:[%s6732_s9 + $0x123] sm:$0xff] }
  0xad   : > { %v5461_v9 = vld [vmem:[%s6732_s9 + $0xc4] sm:$0xff] }
  0xaf   : > { %6197 = vmatmul.mubr.msk.f32.gmra.mxu1 %vm342_vm0, %v6989_v26  ;;  %6253 = vmatmul.mubr.msk.f32.gmra.mxu0 %vm342_vm0, %v5316_v10  ;;  %v5330_v26 = vld [vmem:[%s6732_s9 + $0x12b] sm:$0xff] }
  0xb0   : > { %6199 = vmatprep.mubr.msk.f32.mxu1 %vm342_vm0, %v6993_v28  ;;  %6255 = vmatprep.mubr.msk.f32.mxu0 %vm342_vm0, %v5317_v11  ;;  %v5441_v28 = vld [vmem:[%s6732_s9 + $0x24] sm:$0xff] }
  0xb3   : > { %6200 = vmatmul.mubr.msk.f32.gmra.mxu1 %vm342_vm0, %v7003_v30  ;;  %6256 = vmatmul.mubr.msk.f32.gmra.mxu0 %vm342_vm0, %v5318_v12  ;;  %v5442_v30 = vld [vmem:[%s6732_s9 + $0x2c] sm:$0xff] }
  0xb4   : > { %6202 = vmatprep.mubr.msk.f32.mxu1 %vm342_vm0, %v7007_v32  ;;  %6258 = vmatprep.mubr.msk.f32.mxu0 %vm342_vm0, %v5319_v13  ;;  %v5444_v32 = vld [vmem:[%s6732_s9 + $0x3c] sm:$0xff]  ;;  %v5462_v12 = vld [vmem:[%s6732_s9 + $0xcc] sm:$0xff] }
  0xb7   : > { %6203 = vmatmul.mubr.msk.f32.gmra.mxu1 %vm342_vm0, %v7017_v34  ;;  %6259 = vmatmul.mubr.msk.f32.gmra.mxu0 %vm342_vm0, %v5320_v14  ;;  %v5446_v34 = vld [vmem:[%s6732_s9 + $0x4c] sm:$0xff] }
  0xb8   : > { %6205 = vmatprep.mubr.msk.f32.mxu1 %vm342_vm0, %v7021_v36  ;;  %6261 = vmatprep.mubr.msk.f32.mxu0 %vm342_vm0, %v5321_v15  ;;  %v5448_v36 = vld [vmem:[%s6732_s9 + $0x5c] sm:$0xff]  ;;  %v5463_v15 = vld [vmem:[%s6732_s9 + $0xd4] sm:$0xff] }
  0xbb   : > { %6206 = vmatmul.mubr.msk.f32.gmra.mxu1 %vm342_vm0, %v7031_v38  ;;  %6262 = vmatmul.mubr.msk.f32.gmra.mxu0 %vm342_vm0, %v5322_v16  ;;  %v7364_v16 = vld [vmem:[%s8064_s2] ss:$0 sm:$0xff] }
  0xbc   : > { %6208 = vmatprep.mubr.msk.f32.mxu1 %vm342_vm0, %v7035_v40  ;;  %6264 = vmatprep.mubr.msk.f32.mxu0 %vm342_vm0, %v5323_v17  ;;  %v5450_v40 = vld [vmem:[%s6732_s9 + $0x6c] sm:$0xff] }
  0xbf   : > { %6209 = vmatmul.mubr.msk.f32.gmra.mxu1 %vm342_vm0, %v7045_v42  ;;  %6265 = vmatmul.mubr.msk.f32.gmra.mxu0 %vm342_vm0, %v5324_v18 }
  0xc0   : > { %6211 = vmatprep.mubr.msk.f32.mxu1 %vm342_vm0, %v7049_v44  ;;  %6267 = vmatprep.mubr.msk.f32.mxu0 %vm342_vm0, %v5325_v19 }
  0xc3   : > { %6212 = vmatmul.mubr.msk.f32.gmra.mxu1 %vm342_vm0, %v7059_v49  ;;  %6268 = vmatmul.mubr.msk.f32.gmra.mxu0 %vm342_vm0, %v5326_v20  ;;  %v5452_v49 = vld [vmem:[%s6732_s9 + $0x7c] sm:$0xff] }
  0xc4   : > { %6214 = vmatprep.mubr.msk.f32.mxu1 %vm342_vm0, %v7063_v53  ;;  %6270 = vmatprep.mubr.msk.f32.mxu0 %vm342_vm0, %v5327_v21  ;;  %v5464_v20 = vld [vmem:[%s6732_s9 + $0xdc] sm:$0xff] }
  0xc7   : > { %6215 = vmatmul.mubr.msk.f32.gmra.mxu1 %vm342_vm0, %v7073_v57  ;;  %6271 = vmatmul.mubr.msk.f32.gmra.mxu0 %vm342_vm0, %v5328_v22 }
  0xc8   : > { %6217 = vmatprep.mubr.msk.f32.mxu1 %vm342_vm0, %v5256_v23  ;;  %6273 = vmatprep.mubr.msk.f32.mxu0 %vm342_vm0, %v5329_v24  ;;  %v5465_v23 = vld [vmem:[%s6732_s9 + $0xe4] sm:$0xff] }
  0xcb   : > { %6218 = vmatmul.mubr.msk.f32.gmra.mxu1 %vm342_vm0, %v5257_v25  ;;  %6274 = vmatmul.mubr.msk.f32.gmra.mxu0 %vm342_vm0, %v5330_v26 }
  0xcc   : > { %6278 = vmatprep.mubr.msk.f32.mxu1 %vm342_vm0, %v5368_v27  ;;  %6334 = vmatprep.mubr.msk.f32.mxu0 %vm342_vm0, %v5441_v28 }
  0xcf   : > { %6279 = vmatmul.mubr.msk.f32.vlgmr.msra.gmra.mxu1 %vm342_vm0, %v5369_v29  ;;  %6335 = vmatmul.mubr.msk.f32.vlgmr.msra.gmra.mxu0 %vm342_vm0, %v5442_v30 }
  0xd0   : > { %6389 = vmatpush3.msra.mxu1 %v7090_v1  ;;  %6445 = vmatpush3.msra.mxu0 %v7095_v46  ;;  %v5455_v46 = vld [vmem:[%s6732_s9 + $0x94] sm:$0xff] }
  0xd1   : > { %6281 = vmatprep.mubr.msk.f32.mxu1 %vm342_vm0, %v5441_v28  ;;  %6337 = vmatprep.mubr.msk.f32.mxu0 %vm342_vm0, %v5443_v31  ;;  %v5466_v28 = vld [vmem:[%s6732_s9 + $0xec] sm:$0xff] }
  0xd3   : > { %6282 = vmatmul.mubr.msk.f32.gmra.mxu1 %vm342_vm0, %v5442_v30  ;;  %6338 = vmatmul.mubr.msk.f32.gmra.mxu0 %vm342_vm0, %v5444_v32 }
  0xd4   : > { %6284 = vmatprep.mubr.msk.f32.mxu1 %vm342_vm0, %v5443_v31  ;;  %6340 = vmatprep.mubr.msk.f32.mxu0 %vm342_vm0, %v5445_v33  ;;  %v5467_v31 = vld [vmem:[%s6732_s9 + $0xf4] sm:$0xff] }
  0xd7   : > { %6285 = vmatmul.mubr.msk.f32.gmra.mxu1 %vm342_vm0, %v5444_v32  ;;  %6341 = vmatmul.mubr.msk.f32.gmra.mxu0 %vm342_vm0, %v5446_v34 }
  0xd8   : > { %6287 = vmatprep.mubr.msk.f32.mxu1 %vm342_vm0, %v5445_v33  ;;  %6343 = vmatprep.mubr.msk.f32.mxu0 %vm342_vm0, %v5447_v35 }
  0xdb   : > { %v7263_v38 = vpop.f32.mrf.mxu0  ;;  %v7265_v39 = vpop.f32.mrf.mxu1  ;;  %6288 = vmatmul.mubr.msk.f32.gmra.mxu1 %vm342_vm0, %v5446_v34  ;;  %6344 = vmatmul.mubr.msk.f32.gmra.mxu0 %vm342_vm0, %v5448_v36 }
  0xdc   : > { %6290 = vmatprep.mubr.msk.f32.mxu1 %vm342_vm0, %v5447_v35  ;;  %6346 = vmatprep.mubr.msk.f32.mxu0 %vm342_vm0, %v5449_v37  ;;  %v697_v32 = vadd.f32 %v7263_v38, %v7364_v16 }
  0xdd   : > { %v7272_v41 = vpop.f32.mrf.mxu0  ;;  %v7274_v42 = vpop.f32.mrf.mxu1 }
  0xdf   : > { %v7277_v44 = vpop.f32.mrf.mxu0  ;;  %v7279_v45 = vpop.f32.mrf.mxu1  ;;  %6291 = vmatmul.mubr.msk.f32.gmra.mxu1 %vm342_vm0, %v5448_v36  ;;  %6347 = vmatmul.mubr.msk.f32.gmra.mxu0 %vm342_vm0, %v5450_v40  ;;  %v696_v36 = vadd.f32 %v7364_v16, %v7272_v41 }
  0xe0   : > { %6293 = vmatprep.mubr.msk.f32.mxu1 %vm342_vm0, %v5449_v37  ;;  %6349 = vmatprep.mubr.msk.f32.mxu0 %vm342_vm0, %v5451_v43 }
  0xe1   : > { %v7286_v51 = vpop.f32.mrf.mxu0  ;;  %v7288_v53 = vpop.f32.mrf.mxu1 }
  0xe2   : > { %v698_v41 = vadd.f32 %v7364_v16, %v7286_v51 }
  0xe3   : > { %v7291_v57 = vpop.f32.mrf.mxu0  ;;  %v7293_v59 = vpop.f32.mrf.mxu1  ;;  %6294 = vmatmul.mubr.msk.f32.gmra.mxu1 %vm342_vm0, %v5450_v40  ;;  %6350 = vmatmul.mubr.msk.f32.gmra.mxu0 %vm342_vm0, %v5452_v49  ;;  %v5468_v40 = vld [vmem:[%s6732_s9 + $0xfc] sm:$0xff] }
  0xe4   : > { %6296 = vmatprep.mubr.msk.f32.mxu1 %vm342_vm0, %v5451_v43  ;;  %6352 = vmatprep.mubr.msk.f32.mxu0 %vm342_vm0, %v5453_v55 }
  0xe5   : > { %v7300_v63 = vpop.f32.mrf.mxu0  ;;  %v7302_v1 = vpop.f32.mrf.mxu1 }
  0xe7   : > { %v7305_v3 = vpop.f32.mrf.mxu0  ;;  %v7307_v50 = vpop.f32.mrf.mxu1  ;;  %6297 = vmatmul.mubr.msk.f32.gmra.mxu1 %vm342_vm0, %v5452_v49  ;;  %6353 = vmatmul.mubr.msk.f32.gmra.mxu0 %vm342_vm0, %v5454_v61  ;;  %v5469_v49 = vld [vmem:[%s6732_s9 + $0x104] sm:$0xff] }
  0xe8   : > { %6299 = vmatprep.mubr.msk.f32.mxu1 %vm342_vm0, %v5453_v55  ;;  %6355 = vmatprep.mubr.msk.f32.mxu0 %vm342_vm0, %v5455_v46  ;;  %v699_v55 = vadd.f32 %v7277_v44, %v7364_v16  ;;  %v5470_v44 = vld [vmem:[%s6732_s9 + $0x10c] sm:$0xff] }
  0xe9   : > { %v7314_v48 = vpop.f32.mrf.mxu0  ;;  %v7316_v52 = vpop.f32.mrf.mxu1 }
  0xeb   : > { %v7319_v56 = vpop.f32.mrf.mxu0  ;;  %v7321_v58 = vpop.f32.mrf.mxu1  ;;  %6300 = vmatmul.mubr.msk.f32.gmra.mxu1 %vm342_vm0, %v5454_v61  ;;  %6356 = vmatmul.mubr.msk.f32.gmra.mxu0 %vm342_vm0, %v5456_v47 }
  0xec   : > { %6302 = vmatprep.mubr.msk.f32.mxu1 %vm342_vm0, %v5455_v46  ;;  %6358 = vmatprep.mubr.msk.f32.mxu0 %vm342_vm0, %v5457_v54 }
  0xed   : > { %v7328_v62 = vpop.f32.mrf.mxu0  ;;  %v7330_v0 = vpop.f32.mrf.mxu1 }
  0xef   : > { %v7333_v4 = vpop.f32.mrf.mxu0  ;;  %v7335_v5 = vpop.f32.mrf.mxu1  ;;  %6303 = vmatmul.mubr.msk.f32.gmra.mxu1 %vm342_vm0, %v5456_v47  ;;  %6359 = vmatmul.mubr.msk.f32.gmra.mxu0 %vm342_vm0, %v5458_v60 }
  0xf0   : > { %6305 = vmatprep.mubr.msk.f32.mxu1 %vm342_vm0, %v5457_v54  ;;  %6361 = vmatprep.mubr.msk.f32.mxu0 %vm342_vm0, %v5459_v2 }
  0xf1   : > { %v7342_v7 = vpop.f32.mrf.mxu0  ;;  %v7344_v8 = vpop.f32.mrf.mxu1 }
  0xf3   : > { %v7347_v10 = vpop.f32.mrf.mxu0  ;;  %v7349_v11 = vpop.f32.mrf.mxu1  ;;  %6306 = vmatmul.mubr.msk.f32.gmra.mxu1 %vm342_vm0, %v5458_v60  ;;  %6362 = vmatmul.mubr.msk.f32.gmra.mxu0 %vm342_vm0, %v5460_v6 }
  0xf4   : > { %6308 = vmatprep.mubr.msk.f32.mxu1 %vm342_vm0, %v5459_v2  ;;  %6364 = vmatprep.mubr.msk.f32.mxu0 %vm342_vm0, %v5461_v9 }
  0xf5   : > { %v7356_v13 = vpop.f32.mrf.mxu0  ;;  %v7358_v14 = vpop.f32.mrf.mxu1 }
  0xf7   : > { %v7366_v17 = vpop.f32.mrf.mxu0  ;;  %v6048_v18 = vpop.f32.mrf.mxu1  ;;  %6309 = vmatmul.mubr.msk.f32.gmra.mxu1 %vm342_vm0, %v5460_v6  ;;  %6365 = vmatmul.mubr.msk.f32.gmra.mxu0 %vm342_vm0, %v5462_v12 }
  0xf8   : > { %v7371_v19 = vadd.f32 %v6048_v18, %v7364_v16  ;;  %6311 = vmatprep.mubr.msk.f32.mxu1 %vm342_vm0, %v5461_v9  ;;  %6367 = vmatprep.mubr.msk.f32.mxu0 %vm342_vm0, %v5463_v15 }
  0xf9   : > { %v7376_v21 = vpop.f32.mrf.mxu0  ;;  %v677_v22 = vpop.f32.mrf.mxu1 }
  0xfa   : > { %v7380_v24 = vadd.f32 %v7364_v16, %v677_v22 }
  0xfb   : > { %v7382_v25 = vpop.f32.mrf.mxu0  ;;  %v6051_v26 = vpop.f32.mrf.mxu1  ;;  %6312 = vmatmul.mubr.msk.f32.gmra.mxu1 %vm342_vm0, %v5462_v12  ;;  %6368 = vmatmul.mubr.msk.f32.gmra.mxu0 %vm342_vm0, %v5464_v20  ;;  %v5471_v12 = vld [vmem:[%s6732_s9 + $0x114] sm:$0xff] }
  0xfc   : > { %v7387_v27 = vadd.f32 %v6051_v26, %v7364_v16  ;;  %6314 = vmatprep.mubr.msk.f32.mxu1 %vm342_vm0, %v5463_v15  ;;  %6370 = vmatprep.mubr.msk.f32.mxu0 %vm342_vm0, %v5465_v23  ;;  %v701_v15 = vadd.f32 %v7291_v57, %v7364_v16  ;;  %v5472_v57 = vld [vmem:[%s6732_s9 + $0x11c] sm:$0xff] }
  0xfd   : > { %v7392_v29 = vpop.f32.mrf.mxu0  ;;  %v687_v30 = vpop.f32.mrf.mxu1 }
  0xfe   : > { %v7398_v33 = vadd.f32 %v7364_v16, %v687_v30 }
  0xff   : > { %v6056_v34 = vpop.f32.mrf.mxu1  ;;  %v6112_v35 = vpop.f32.mrf.mxu0  ;;  %6315 = vmatmul.mubr.msk.f32.gmra.mxu1 %vm342_vm0, %v5464_v20  ;;  %6371 = vmatmul.mubr.msk.f32.gmra.mxu0 %vm342_vm0, %v5466_v28 }
 0x100   : > { %v1198_v37 = vadd.f32 %v6056_v34, %v697_v32  ;;  %6317 = vmatprep.mubr.msk.f32.mxu1 %vm342_vm0, %v5465_v23  ;;  %6373 = vmatprep.mubr.msk.f32.mxu0 %vm342_vm0, %v5467_v31  ;;  %v700_v23 = vadd.f32 %v7364_v16, %v7300_v63  ;;  %v5473_v32 = vld [vmem:[%s6732_s9 + $0x124] sm:$0xff]  ;;  %v703_v34 = vadd.f32 %v7305_v3, %v7364_v16  ;;  %v5474_v3 = vld [vmem:[%s6732_s9 + $0x12c] sm:$0xff] }
 0x101   : > { %v1018_v38 = vpop.f32.mrf.mxu1  ;;  %v1519_v43 = vpop.f32.mrf.mxu0 }
 0x102   : > { %v7410_v61 = vadd.f32 %v6112_v35, %v1198_v37  ;;  %v1197_v46 = vadd.f32 %v1018_v38, %v696_v36 }
 0x103   : > { %v6059_v47 = vpop.f32.mrf.mxu1  ;;  %v6115_v54 = vpop.f32.mrf.mxu0  ;;  %6318 = vmatmul.mubr.msk.f32.gmra.mxu1 %vm342_vm0, %v5466_v28  ;;  %6374 = vmatmul.mubr.msk.f32.gmra.mxu0 %vm342_vm0, %v5468_v40 }
 0x104   : > { %v7416_v60 = vadd.f32 %v1519_v43, %v1197_v46  ;;  %v1200_v2 = vadd.f32 %v6059_v47, %v699_v55  ;;  %6320 = vmatprep.mubr.msk.f32.mxu1 %vm342_vm0, %v5467_v31  ;;  %6376 = vmatprep.mubr.msk.f32.mxu0 %vm342_vm0, %v5469_v49  ;;  %v5475_v46 = vld [vmem:[%s6732_s9 + $0x134] sm:$0xff]  ;;  %v705_v47 = vadd.f32 %v7319_v56, %v7364_v16  ;;  %v5476_v56 = vld [vmem:[%s6732_s9 + $0x13c] sm:$0xff] }
 0x105   : > { %v1028_v6 = vpop.f32.mrf.mxu1  ;;  %v1529_v9 = vpop.f32.mrf.mxu0 }
 0x106   : > { %v7424_v18 = vadd.f32 %v6115_v54, %v1200_v2  ;;  %v1199_v20 = vadd.f32 %v1028_v6, %v698_v41 }
 0x107   : > { %v6062_v51 = vpop.f32.mrf.mxu1  ;;  %v6118_v22 = vpop.f32.mrf.mxu0  ;;  %6321 = vmatmul.mubr.msk.f32.gmra.mxu1 %vm342_vm0, %v5468_v40  ;;  %6377 = vmatmul.mubr.msk.f32.gmra.mxu0 %vm342_vm0, %v5470_v44  ;;  %v702_v40 = vadd.f32 %v7364_v16, %v7314_v48 }
 0x108   : > { %v7430_v26 = vadd.f32 %v1529_v9, %v1199_v20  ;;  %v1202_v28 = vadd.f32 %v6062_v51, %v701_v15  ;;  %6323 = vmatprep.mubr.msk.f32.mxu1 %vm342_vm0, %v5469_v49  ;;  %6379 = vmatprep.mubr.msk.f32.mxu0 %vm342_vm0, %v5471_v12  ;;  %v5514_v20 = vld [vmem:[%s6732_s9 + $0x25] sm:$0xff] }
 0x109   : > { %v1038_v30 = vpop.f32.mrf.mxu1  ;;  %v1539_v31 = vpop.f32.mrf.mxu0  ;;  %v5587_v51 = vld [vmem:[%s6732_s9 + $0x26] sm:$0xff] }
 0x10a   : > { %v7438_v35 = vadd.f32 %v6118_v22, %v1202_v28  ;;  %v1201_v36 = vadd.f32 %v1038_v30, %v700_v23  ;;  %v707_v22 = vadd.f32 %v7333_v4, %v7364_v16  ;;  %v706_v30 = vadd.f32 %v7364_v16, %v7342_v7  ;;  %v5515_v4 = vld [vmem:[%s6732_s9 + $0x2d] sm:$0xff] }
 0x10b   : > { %v6065_v63 = vpop.f32.mrf.mxu1  ;;  %v6121_v37 = vpop.f32.mrf.mxu0  ;;  %6324 = vmatmul.mubr.msk.f32.gmra.mxu1 %vm342_vm0, %v5470_v44  ;;  %6380 = vmatmul.mubr.msk.f32.gmra.mxu0 %vm342_vm0, %v5472_v57  ;;  %v704_v44 = vadd.f32 %v7364_v16, %v7328_v62 }
 0x10c   : > { %v7444_v38 = vadd.f32 %v1539_v31, %v1201_v36  ;;  %v1204_v43 = vadd.f32 %v6065_v63, %v703_v34  ;;  %6326 = vmatprep.mubr.msk.f32.mxu1 %vm342_vm0, %v5471_v12  ;;  %6382 = vmatprep.mubr.msk.f32.mxu0 %vm342_vm0, %v5473_v32  ;;  %v5588_v34 = vld [vmem:[%s6732_s9 + $0x2e] sm:$0xff] }
 0x10d   : > { %v1048_v49 = vpop.f32.mrf.mxu1  ;;  %v1549_v55 = vpop.f32.mrf.mxu0 }
 0x10e   : > { %v7452_v54 = vadd.f32 %v6121_v37, %v1204_v43  ;;  %v1203_v48 = vadd.f32 %v1048_v49, %v702_v40  ;;  %v5516_v37 = vld [vmem:[%s6732_s9 + $0x35] sm:$0xff]  ;;  %v709_v43 = vadd.f32 %v7347_v10, %v7364_v16  ;;  %v5517_v10 = vld [vmem:[%s6732_s9 + $0x3d] sm:$0xff] }
 0x10f   : > { %v6068_v41 = vpop.f32.mrf.mxu1  ;;  %v6124_v2 = vpop.f32.mrf.mxu0  ;;  %6327 = vmatmul.mubr.msk.f32.gmra.mxu1 %vm342_vm0, %v5472_v57  ;;  %6383 = vmatmul.mubr.msk.f32.gmra.mxu0 %vm342_vm0, %v5474_v3  ;;  %v5589_v40 = vld [vmem:[%s6732_s9 + $0x36] sm:$0xff] }
 0x110   : > { %v7458_v6 = vadd.f32 %v1549_v55, %v1203_v48  ;;  %v1206_v9 = vadd.f32 %v6068_v41, %v705_v47  ;;  %6329 = vmatprep.mubr.msk.f32.mxu1 %vm342_vm0, %v5473_v32  ;;  %6385 = vmatprep.mubr.msk.f32.mxu0 %vm342_vm0, %v5475_v46  ;;  %v708_v46 = vadd.f32 %v7364_v16, %v7356_v13  ;;  %v5590_v41 = vld [vmem:[%s6732_s9 + $0x3e] sm:$0xff] }
 0x111   : > { %v1058_v12 = vpop.f32.mrf.mxu1  ;;  %v1559_v15 = vpop.f32.mrf.mxu0 }
 0x112   : > { %v7467_v23 = vadd.f32 %v6124_v2, %v1206_v9  ;;  %v1205_v62 = vadd.f32 %v1058_v12, %v704_v44  ;;  %v5518_v9 = vld [vmem:[%s6732_s9 + $0x45] sm:$0xff]  ;;  %v711_v12 = vadd.f32 %v7366_v17, %v7364_v16  ;;  %v5519_v17 = vld [vmem:[%s6732_s9 + $0x4d] sm:$0xff] }
 0x113   : > { %v6071_v28 = vpop.f32.mrf.mxu1  ;;  %v6127_v57 = vpop.f32.mrf.mxu0  ;;  %6330 = vmatmul.mubr.msk.f32.gmra.mxu1 %vm342_vm0, %v5474_v3  ;;  %6386 = vmatmul.mubr.msk.f32.gmra.mxu0 %vm342_vm0, %v5476_v56  ;;  %v5591_v56 = vld [vmem:[%s6732_s9 + $0x46] sm:$0xff] }
 0x114   : > { %v7473_v31 = vadd.f32 %v1559_v15, %v1205_v62  ;;  %v1208_v32 = vadd.f32 %v6071_v28, %v707_v22  ;;  %6390 = vmatprep.mubr.msk.f32.mxu1 %vm342_vm0, %v5514_v20  ;;  %6446 = vmatprep.mubr.msk.f32.mxu0 %vm342_vm0, %v5587_v51  ;;  %v710_v22 = vadd.f32 %v7364_v16, %v7376_v21 }
 0x115   : > { %v1068_v36 = vpop.f32.mrf.mxu1  ;;  %v1569_v63 = vpop.f32.mrf.mxu0 }
 0x116   : > { %v7483_v7 = vadd.f32 %v6127_v57, %v1208_v32  ;;  %v1207_v3 = vadd.f32 %v1068_v36, %v706_v30  ;;  %v5592_v57 = vld [vmem:[%s6732_s9 + $0x4e] sm:$0xff]  ;;  %v713_v36 = vadd.f32 %v7382_v25, %v7364_v16  ;;  %v5521_v25 = vld [vmem:[%s6732_s9 + $0x5d] sm:$0xff] }
 0x117   : > { %v6074_v49 = vpop.f32.mrf.mxu1  ;;  %v6130_v55 = vpop.f32.mrf.mxu0  ;;  %6391 = vmatmul.mubr.msk.f32.vlgmr.msra.gmra.mxu1 %vm342_vm0, %v5515_v4  ;;  %6447 = vmatmul.mubr.msk.f32.vlgmr.msra.gmra.mxu0 %vm342_vm0, %v5588_v34  ;;  %v5520_v4 = vld [vmem:[%s6732_s9 + $0x55] sm:$0xff] }
 0x118   : > { %v7489_v47 = vadd.f32 %v1569_v63, %v1207_v3  ;;  %v1210_v48 = vadd.f32 %v6074_v49, %v709_v43  ;;  %6393 = vmatprep.mubr.msk.f32.mxu1 %vm342_vm0, %v5516_v37  ;;  %6449 = vmatprep.mubr.msk.f32.mxu0 %vm342_vm0, %v5589_v40  ;;  %v5593_v34 = vld [vmem:[%s6732_s9 + $0x56] sm:$0xff]  ;;  %v712_v43 = vadd.f32 %v7364_v16, %v7392_v29 }
 0x119   : > { %v1078_v2 = vpop.f32.mrf.mxu1  ;;  %v1579_v44 = vpop.f32.mrf.mxu0 }
 0x11a   : > { %v7499_v13 = vadd.f32 %v6130_v55, %v1210_v48  ;;  %v1209_v15 = vadd.f32 %v1078_v2, %v708_v46  ;;  %v5594_v55 = vld [vmem:[%s6732_s9 + $0x5e] sm:$0xff]  ;;  %v715_v2 = vadd.f32 %v7265_v39, %v7364_v16  ;;  %v5523_v39 = vld [vmem:[%s6732_s9 + $0x6d] sm:$0xff] }
 0x11b   : > { %v6077_v20 = vpop.f32.mrf.mxu1  ;;  %v6133_v51 = vpop.f32.mrf.mxu0  ;;  %6394 = vmatmul.mubr.msk.f32.gmra.mxu1 %vm342_vm0, %v5517_v10  ;;  %6450 = vmatmul.mubr.msk.f32.gmra.mxu0 %vm342_vm0, %v5590_v41  ;;  %v5522_v10 = vld [vmem:[%s6732_s9 + $0x65] sm:$0xff] }
 0x11c   : > { %v7505_v62 = vadd.f32 %v1579_v44, %v1209_v15  ;;  %v1212_v28 = vadd.f32 %v6077_v20, %v711_v12  ;;  %6396 = vmatprep.mubr.msk.f32.mxu1 %vm342_vm0, %v5518_v9  ;;  %6452 = vmatprep.mubr.msk.f32.mxu0 %vm342_vm0, %v5591_v56  ;;  %v5595_v41 = vld [vmem:[%s6732_s9 + $0x66] sm:$0xff]  ;;  %v714_v12 = vadd.f32 %v7364_v16, %v7274_v42 }
 0x11d   : > { %v1088_v30 = vpop.f32.mrf.mxu1  ;;  %v1589_v32 = vpop.f32.mrf.mxu0 }
 0x11e   : > { %v7515_v21 = vadd.f32 %v6133_v51, %v1212_v28  ;;  %v1211_v63 = vadd.f32 %v1088_v30, %v710_v22  ;;  %v5596_v51 = vld [vmem:[%s6732_s9 + $0x6e] sm:$0xff]  ;;  %v717_v30 = vadd.f32 %v7279_v45, %v7364_v16  ;;  %v5525_v45 = vld [vmem:[%s6732_s9 + $0x7d] sm:$0xff] }
 0x11f   : > { %v6080_v37 = vpop.f32.mrf.mxu1  ;;  %v6136_v40 = vpop.f32.mrf.mxu0  ;;  %6397 = vmatmul.mubr.msk.f32.gmra.mxu1 %vm342_vm0, %v5519_v17  ;;  %6453 = vmatmul.mubr.msk.f32.gmra.mxu0 %vm342_vm0, %v5592_v57  ;;  %v5524_v17 = vld [vmem:[%s6732_s9 + $0x75] sm:$0xff] }
 0x120   : > { %v7521_v3 = vadd.f32 %v1589_v32, %v1211_v63  ;;  %v1214_v49 = vadd.f32 %v6080_v37, %v713_v36  ;;  %6399 = vmatprep.mubr.msk.f32.mxu1 %vm342_vm0, %v5520_v4  ;;  %6455 = vmatprep.mubr.msk.f32.mxu0 %vm342_vm0, %v5593_v34  ;;  %v5597_v57 = vld [vmem:[%s6732_s9 + $0x76] sm:$0xff]  ;;  %v716_v36 = vadd.f32 %v7364_v16, %v7288_v53 }
 0x121   : > { %v1098_v46 = vpop.f32.mrf.mxu1  ;;  %v1599_v48 = vpop.f32.mrf.mxu0 }
 0x122   : > { %v7531_v29 = vadd.f32 %v6136_v40, %v1214_v49  ;;  %v1213_v44 = vadd.f32 %v1098_v46, %v712_v43  ;;  %v5598_v40 = vld [vmem:[%s6732_s9 + $0x7e] sm:$0xff]  ;;  %v719_v46 = vadd.f32 %v7293_v59, %v7364_v16  ;;  %v5527_v59 = vld [vmem:[%s6732_s9 + $0x8d] sm:$0xff] }
 0x123   : > { %v6083_v9 = vpop.f32.mrf.mxu1  ;;  %v6139_v56 = vpop.f32.mrf.mxu0  ;;  %6400 = vmatmul.mubr.msk.f32.gmra.mxu1 %vm342_vm0, %v5521_v25  ;;  %6456 = vmatmul.mubr.msk.f32.gmra.mxu0 %vm342_vm0, %v5594_v55  ;;  %v5526_v25 = vld [vmem:[%s6732_s9 + $0x85] sm:$0xff] }
 0x124   : > { %v7537_v15 = vadd.f32 %v1599_v48, %v1213_v44  ;;  %v1216_v20 = vadd.f32 %v6083_v9, %v715_v2  ;;  %6402 = vmatprep.mubr.msk.f32.mxu1 %vm342_vm0, %v5522_v10  ;;  %6458 = vmatprep.mubr.msk.f32.mxu0 %vm342_vm0, %v5595_v41  ;;  %v5599_v55 = vld [vmem:[%s6732_s9 + $0x86] sm:$0xff]  ;;  %v718_v2 = vadd.f32 %v7364_v16, %v7302_v1 }
 0x125   : > { %v1108_v22 = vpop.f32.mrf.mxu1  ;;  %v1609_v28 = vpop.f32.mrf.mxu0 }
 0x126   : > { %v7547_v42 = vadd.f32 %v6139_v56, %v1216_v20  ;;  %v1215_v32 = vadd.f32 %v1108_v22, %v714_v12  ;;  %v5600_v56 = vld [vmem:[%s6732_s9 + $0x8e] sm:$0xff]  ;;  %v721_v22 = vadd.f32 %v7307_v50, %v7364_v16  ;;  %v5529_v50 = vld [vmem:[%s6732_s9 + $0x9d] sm:$0xff] }
 0x127   : > { %v6086_v4 = vpop.f32.mrf.mxu1  ;;  %v6142_v34 = vpop.f32.mrf.mxu0  ;;  %6403 = vmatmul.mubr.msk.f32.gmra.mxu1 %vm342_vm0, %v5523_v39  ;;  %6459 = vmatmul.mubr.msk.f32.gmra.mxu0 %vm342_vm0, %v5596_v51  ;;  %v5528_v39 = vld [vmem:[%s6732_s9 + $0x95] sm:$0xff] }
 0x128   : > { %v7553_v63 = vadd.f32 %v1609_v28, %v1215_v32  ;;  %v1218_v37 = vadd.f32 %v6086_v4, %v717_v30  ;;  %6405 = vmatprep.mubr.msk.f32.mxu1 %vm342_vm0, %v5524_v17  ;;  %6461 = vmatprep.mubr.msk.f32.mxu0 %vm342_vm0, %v5597_v57  ;;  %v5601_v51 = vld [vmem:[%s6732_s9 + $0x96] sm:$0xff]  ;;  %v720_v30 = vadd.f32 %v7364_v16, %v7316_v52 }
 0x129   : > { %v1118_v43 = vpop.f32.mrf.mxu1  ;;  %v1619_v49 = vpop.f32.mrf.mxu0 }
 0x12a   : > { %v7563_v53 = vadd.f32 %v6142_v34, %v1218_v37  ;;  %v1217_v48 = vadd.f32 %v1118_v43, %v716_v36  ;;  %v5602_v34 = vld [vmem:[%s6732_s9 + $0x9e] sm:$0xff]  ;;  %v723_v43 = vadd.f32 %v7321_v58, %v7364_v16  ;;  %v5531_v58 = vld [vmem:[%s6732_s9 + $0xad] sm:$0xff] }
 0x12b   : > { %v6089_v10 = vpop.f32.mrf.mxu1  ;;  %v6145_v41 = vpop.f32.mrf.mxu0  ;;  %6406 = vmatmul.mubr.msk.f32.gmra.mxu1 %vm342_vm0, %v5525_v45  ;;  %6462 = vmatmul.mubr.msk.f32.gmra.mxu0 %vm342_vm0, %v5598_v40  ;;  %v5530_v45 = vld [vmem:[%s6732_s9 + $0xa5] sm:$0xff] }
 0x12c   : > { %v7569_v44 = vadd.f32 %v1619_v49, %v1217_v48  ;;  %v1220_v9 = vadd.f32 %v6089_v10, %v719_v46  ;;  %6408 = vmatprep.mubr.msk.f32.mxu1 %vm342_vm0, %v5526_v25  ;;  %6464 = vmatprep.mubr.msk.f32.mxu0 %vm342_vm0, %v5599_v55  ;;  %v5603_v40 = vld [vmem:[%s6732_s9 + $0xa6] sm:$0xff]  ;;  %v722_v46 = vadd.f32 %v7364_v16, %v7330_v0 }
 0x12d   : > { %v1128_v12 = vpop.f32.mrf.mxu1  ;;  %v1629_v20 = vpop.f32.mrf.mxu0 }
 0x12e   : > { %v7579_v1 = vadd.f32 %v6145_v41, %v1220_v9  ;;  %v1219_v28 = vadd.f32 %v1128_v12, %v718_v2  ;;  %v5604_v41 = vld [vmem:[%s6732_s9 + $0xae] sm:$0xff]  ;;  %v725_v12 = vadd.f32 %v7335_v5, %v7364_v16  ;;  %v5533_v5 = vld [vmem:[%s6732_s9 + $0xbd] sm:$0xff] }
 0x12f   : > { %v6092_v17 = vpop.f32.mrf.mxu1  ;;  %v6148_v57 = vpop.f32.mrf.mxu0  ;;  %6409 = vmatmul.mubr.msk.f32.gmra.mxu1 %vm342_vm0, %v5527_v59  ;;  %6465 = vmatmul.mubr.msk.f32.gmra.mxu0 %vm342_vm0, %v5600_v56  ;;  %v5532_v59 = vld [vmem:[%s6732_s9 + $0xb5] sm:$0xff] }
 0x130   : > { %v7585_v32 = vadd.f32 %v1629_v20, %v1219_v28  ;;  %v1222_v4 = vadd.f32 %v6092_v17, %v721_v22  ;;  %6411 = vmatprep.mubr.msk.f32.mxu1 %vm342_vm0, %v5528_v39  ;;  %6467 = vmatprep.mubr.msk.f32.mxu0 %vm342_vm0, %v5601_v51  ;;  %v5605_v56 = vld [vmem:[%s6732_s9 + $0xb6] sm:$0xff]  ;;  %v724_v22 = vadd.f32 %v7364_v16, %v7344_v8 }
 0x131   : > { %v1138_v36 = vpop.f32.mrf.mxu1  ;;  %v1639_v37 = vpop.f32.mrf.mxu0 }
 0x132   : > { %v7595_v52 = vadd.f32 %v6148_v57, %v1222_v4  ;;  %v1221_v49 = vadd.f32 %v1138_v36, %v720_v30  ;;  %v5606_v57 = vld [vmem:[%s6732_s9 + $0xbe] sm:$0xff]  ;;  %v727_v36 = vadd.f32 %v7349_v11, %v7364_v16  ;;  %v5535_v11 = vld [vmem:[%s6732_s9 + $0xcd] sm:$0xff] }
 0x133   : > { %v6095_v25 = vpop.f32.mrf.mxu1  ;;  %v6151_v55 = vpop.f32.mrf.mxu0  ;;  %6412 = vmatmul.mubr.msk.f32.gmra.mxu1 %vm342_vm0, %v5529_v50  ;;  %6468 = vmatmul.mubr.msk.f32.gmra.mxu0 %vm342_vm0, %v5602_v34  ;;  %v5534_v50 = vld [vmem:[%s6732_s9 + $0xc5] sm:$0xff] }
 0x134   : > { %v7601_v48 = vadd.f32 %v1639_v37, %v1221_v49  ;;  %v1224_v10 = vadd.f32 %v6095_v25, %v723_v43  ;;  %6414 = vmatprep.mubr.msk.f32.mxu1 %vm342_vm0, %v5530_v45  ;;  %6470 = vmatprep.mubr.msk.f32.mxu0 %vm342_vm0, %v5603_v40  ;;  %v5607_v34 = vld [vmem:[%s6732_s9 + $0xc6] sm:$0xff]  ;;  %v726_v43 = vadd.f32 %v7364_v16, %v7358_v14 }
 0x135   : > { %v1148_v2 = vpop.f32.mrf.mxu1  ;;  %v1649_v9 = vpop.f32.mrf.mxu0 }
 0x136   : > { %v7611_v0 = vadd.f32 %v6151_v55, %v1224_v10  ;;  %v1223_v20 = vadd.f32 %v1148_v2, %v722_v46  ;;  %v5608_v55 = vld [vmem:[%s6732_s9 + $0xce] sm:$0xff] }
 0x137   : > { %v6098_v39 = vpop.f32.mrf.mxu1  ;;  %v6154_v51 = vpop.f32.mrf.mxu0  ;;  %6415 = vmatmul.mubr.msk.f32.gmra.mxu1 %vm342_vm0, %v5531_v58  ;;  %6471 = vmatmul.mubr.msk.f32.gmra.mxu0 %vm342_vm0, %v5604_v41  ;;  %v5536_v58 = vld [vmem:[%s6732_s9 + $0xd5] sm:$0xff] }
 0x138   : > { %v7617_v28 = vadd.f32 %v1649_v9, %v1223_v20  ;;  %v1226_v17 = vadd.f32 %v6098_v39, %v725_v12  ;;  %6417 = vmatprep.mubr.msk.f32.mxu1 %vm342_vm0, %v5532_v59  ;;  %6473 = vmatprep.mubr.msk.f32.mxu0 %vm342_vm0, %v5605_v56  ;;  %v5609_v41 = vld [vmem:[%s6732_s9 + $0xd6] sm:$0xff]  ;;  %v5610_v20 = vld [vmem:[%s6732_s9 + $0xde] sm:$0xff] }
 0x139   : > { %v1158_v30 = vpop.f32.mrf.mxu1  ;;  %v1659_v4 = vpop.f32.mrf.mxu0  ;;  %v5537_v12 = vld [vmem:[%s6732_s9 + $0xdd] sm:$0xff] }
 0x13a   : > { %v7627_v8 = vadd.f32 %v6154_v51, %v1226_v17  ;;  %v1225_v37 = vadd.f32 %v1158_v30, %v724_v22  ;;  %v5538_v22 = vld [vmem:[%s6732_s9 + $0xe5] sm:$0xff] }
 0x13b   : > { %v6101_v45 = vpop.f32.mrf.mxu1  ;;  %v6157_v40 = vpop.f32.mrf.mxu0  ;;  %6418 = vmatmul.mubr.msk.f32.gmra.mxu1 %vm342_vm0, %v5533_v5  ;;  %6474 = vmatmul.mubr.msk.f32.gmra.mxu0 %vm342_vm0, %v5606_v57  ;;  %v5611_v17 = vld [vmem:[%s6732_s9 + $0xe6] sm:$0xff] }
 0x13c   : > { %v7633_v49 = vadd.f32 %v1659_v4, %v1225_v37  ;;  %v1228_v25 = vadd.f32 %v6101_v45, %v727_v36  ;;  %6420 = vmatprep.mubr.msk.f32.mxu1 %vm342_vm0, %v5534_v50  ;;  %6476 = vmatprep.mubr.msk.f32.mxu0 %vm342_vm0, %v5607_v34  ;;  %v5539_v34 = vld [vmem:[%s6732_s9 + $0xed] sm:$0xff]  ;;  %v5540_v45 = vld [vmem:[%s6732_s9 + $0xf5] sm:$0xff] }
 0x13d   : > { %v1168_v46 = vpop.f32.mrf.mxu1  ;;  %v1669_v10 = vpop.f32.mrf.mxu0  ;;  %v5612_v36 = vld [vmem:[%s6732_s9 + $0xee] sm:$0xff] }
 0x13e   : > { %v7641_v2 = vadd.f32 %v6157_v40, %v1228_v25  ;;  %v1227_v14 = vadd.f32 %v1168_v46, %v726_v43  ;;  %v5613_v40 = vld [vmem:[%s6732_s9 + $0xf6] sm:$0xff] }
 0x13f   : > { %v6104_v16 = vpop.f32.mrf.mxu1  ;;  %v6160_v9 = vpop.f32.mrf.mxu0  ;;  %6421 = vmatmul.mubr.msk.f32.gmra.mxu1 %vm342_vm0, %v5535_v11  ;;  %6477 = vmatmul.mubr.msk.f32.gmra.mxu0 %vm342_vm0, %v5608_v55 }
 0x140   : > { %v7645_v59 = vadd.f32 %v1669_v10, %v1227_v14  ;;  %v1230_v56 = vadd.f32 %v6104_v16, %v7371_v19  ;;  %6423 = vmatprep.mubr.msk.f32.mxu1 %vm342_vm0, %v5536_v58  ;;  %6479 = vmatprep.mubr.msk.f32.mxu0 %vm342_vm0, %v5609_v41  ;;  %v5541_v10 = vld [vmem:[%s6732_s9 + $0xfd] sm:$0xff]  ;;  %v5542_v14 = vld [vmem:[%s6732_s9 + $0x105] sm:$0xff] }
 0x141   : > { %v1178_v39 = vpop.f32.mrf.mxu1  ;;  %v1679_v51 = vpop.f32.mrf.mxu0  ;;  %v5614_v58 = vld [vmem:[%s6732_s9 + $0xfe] sm:$0xff]  ;;  %v5615_v16 = vld [vmem:[%s6732_s9 + $0x106] sm:$0xff] }
 0x142   : > { %v7654_v5 = vadd.f32 %v6160_v9, %v1230_v56  ;;  %v1229_v57 = vadd.f32 %v1178_v39, %v7380_v24 }
 0x143   : > { %v6107_v30 = vpop.f32.mrf.mxu1  ;;  %v6163_v19 = vpop.f32.mrf.mxu0  ;;  %6424 = vmatmul.mubr.msk.f32.gmra.mxu1 %vm342_vm0, %v5537_v12  ;;  %6480 = vmatmul.mubr.msk.f32.gmra.mxu0 %vm342_vm0, %v5610_v20 }
 0x144   : > { %v7659_v4 = vadd.f32 %v1679_v51, %v1229_v57  ;;  %v1232_v50 = vadd.f32 %v6107_v30, %v7387_v27  ;;  %6426 = vmatprep.mubr.msk.f32.mxu1 %vm342_vm0, %v5538_v22  ;;  %6482 = vmatprep.mubr.msk.f32.mxu0 %vm342_vm0, %v5611_v17  ;;  %v5543_v51 = vld [vmem:[%s6732_s9 + $0x10d] sm:$0xff]  ;;  %v5544_v57 = vld [vmem:[%s6732_s9 + $0x115] sm:$0xff] }
 0x145   : > { %v1188_v37 = vpop.f32.mrf.mxu1  ;;  %v1689_v24 = vpop.f32.mrf.mxu0  ;;  %v5616_v22 = vld [vmem:[%s6732_s9 + $0x10e] sm:$0xff]  ;;  %v5617_v30 = vld [vmem:[%s6732_s9 + $0x116] sm:$0xff] }
 0x146   : > { %v7668_v43 = vadd.f32 %v6163_v19, %v1232_v50  ;;  %v1231_v25 = vadd.f32 %v1188_v37, %v7398_v33 }
 0x147   : > { %v6168_v11 = vpop.f32.mrf.mxu1  ;;  %v6224_v27 = vpop.f32.mrf.mxu0  ;;  %6427 = vmatmul.mubr.msk.f32.gmra.mxu1 %vm342_vm0, %v5539_v34  ;;  %6483 = vmatmul.mubr.msk.f32.gmra.mxu0 %vm342_vm0, %v5612_v36 }
 0x148   : > { %v7673_v55 = vadd.f32 %v1689_v24, %v1231_v25  ;;  %v2200_v46 = vadd.f32 %v6168_v11, %v7410_v61  ;;  %6429 = vmatprep.mubr.msk.f32.mxu1 %vm342_vm0, %v5540_v45  ;;  %6485 = vmatprep.mubr.msk.f32.mxu0 %vm342_vm0, %v5613_v40  ;;  %v5545_v24 = vld [vmem:[%s6732_s9 + $0x11d] sm:$0xff]  ;;  %v5546_v25 = vld [vmem:[%s6732_s9 + $0x125] sm:$0xff] }
 0x149   : > { %v2020_v41 = vpop.f32.mrf.mxu1  ;;  %v2521_v33 = vpop.f32.mrf.mxu0  ;;  %v5618_v45 = vld [vmem:[%s6732_s9 + $0x11e] sm:$0xff]  ;;  %v5619_v11 = vld [vmem:[%s6732_s9 + $0x126] sm:$0xff] }
 0x14a   : > { %v7682_v9 = vadd.f32 %v6224_v27, %v2200_v46  ;;  %v2199_v56 = vadd.f32 %v2020_v41, %v7416_v60 }
 0x14b   : > { %v6171_v12 = vpop.f32.mrf.mxu1  ;;  %v6227_v61 = vpop.f32.mrf.mxu0  ;;  %6430 = vmatmul.mubr.msk.f32.gmra.mxu1 %vm342_vm0, %v5541_v10  ;;  %6486 = vmatmul.mubr.msk.f32.gmra.mxu0 %vm342_vm0, %v5614_v58 }
 0x14c   : > { %v7687_v20 = vadd.f32 %v2521_v33, %v2199_v56  ;;  %v2202_v39 = vadd.f32 %v6171_v12, %v7424_v18  ;;  %6432 = vmatprep.mubr.msk.f32.mxu1 %vm342_vm0, %v5542_v14  ;;  %6488 = vmatprep.mubr.msk.f32.mxu0 %vm342_vm0, %v5615_v16  ;;  %v5547_v33 = vld [vmem:[%s6732_s9 + $0x12d] sm:$0xff]  ;;  %v5548_v56 = vld [vmem:[%s6732_s9 + $0x135] sm:$0xff] }
 0x14d   : > { %v2030_v17 = vpop.f32.mrf.mxu1  ;;  %v2531_v60 = vpop.f32.mrf.mxu0  ;;  %v5620_v14 = vld [vmem:[%s6732_s9 + $0x12e] sm:$0xff]  ;;  %v5621_v12 = vld [vmem:[%s6732_s9 + $0x136] sm:$0xff] }
 0x14e   : > { %v7696_v19 = vadd.f32 %v6227_v61, %v2202_v39  ;;  %v2201_v50 = vadd.f32 %v2030_v17, %v7430_v26 }
 0x14f   : > { %v6174_v34 = vpop.f32.mrf.mxu1  ;;  %v6230_v18 = vpop.f32.mrf.mxu0  ;;  %6433 = vmatmul.mubr.msk.f32.gmra.mxu1 %vm342_vm0, %v5543_v51  ;;  %6489 = vmatmul.mubr.msk.f32.gmra.mxu0 %vm342_vm0, %v5616_v22 }
 0x150   : > { %v7701_v36 = vadd.f32 %v2531_v60, %v2201_v50  ;;  %v2204_v37 = vadd.f32 %v6174_v34, %v7438_v35  ;;  %6435 = vmatprep.mubr.msk.f32.mxu1 %vm342_vm0, %v5544_v57  ;;  %6491 = vmatprep.mubr.msk.f32.mxu0 %vm342_vm0, %v5617_v30  ;;  %v5549_v60 = vld [vmem:[%s6732_s9 + $0x13d] sm:$0xff] }
 0x151   : > { %v2040_v40 = vpop.f32.mrf.mxu1  ;;  %v2541_v26 = vpop.f32.mrf.mxu0  ;;  %v5622_v57 = vld [vmem:[%s6732_s9 + $0x13e] sm:$0xff]  ;;  %s7935_s9 = scalar_lea.vmem [#allocation3], %s6502_s8 }
 0x152   : > { %v7710_v27 = vadd.f32 %v6230_v18, %v2204_v37  ;;  %v2203_v46 = vadd.f32 %v2040_v40, %v7444_v38  ;;  %s4901_s11 = sshll.u32 %s7935_s9, 4  ;;  %s8011_s11 = int_to_ptr.vmem [resolvable:$true] %s4901_s11 }
 0x153   : > { %v6177_v10 = vpop.f32.mrf.mxu1  ;;  %v6233_v35 = vpop.f32.mrf.mxu0  ;;  %6436 = vmatmul.mubr.msk.f32.gmra.mxu1 %vm342_vm0, %v5545_v24  ;;  %6492 = vmatmul.mubr.msk.f32.gmra.mxu0 %vm342_vm0, %v5618_v45  ;;  %s6562_s23 = scalar_lea.vmem %s8011_s11, 4608  ;;  %p6569_p1 = scmp.lt.s32.totalorder %s8011_s11, %s6567_s27 }
 0x154   : > { %v7715_v58 = vadd.f32 %v2541_v26, %v2203_v46  ;;  %v2206_v41 = vadd.f32 %v6177_v10, %v7452_v54  ;;  %6438 = vmatprep.mubr.msk.f32.mxu1 %vm342_vm0, %v5546_v25  ;;  %6494 = vmatprep.mubr.msk.f32.mxu0 %vm342_vm0, %v5619_v11  ;;  %p6563_p12 = scmp.ne.s32.totalorder %s8011_s11, %s6562_s23  ;;  %p6570_p2 = scmp.lt.s32.totalorder %s6568_s28, %s6562_s23 }
 0x155   : > { %v2050_v16 = vpop.f32.mrf.mxu1  ;;  %v2551_v38 = vpop.f32.mrf.mxu0 }
 0x156   : > { %v7724_v61 = vadd.f32 %v6233_v35, %v2206_v41  ;;  %v2205_v39 = vadd.f32 %v2050_v16, %v7458_v6  ;;  %p6564_p13 = pnand %p6563_p12, %p6703_p4  ;;  %p6571_p3 = por %p6570_p2, %p6569_p1 }
 0x157   : > { %v6180_v51 = vpop.f32.mrf.mxu1  ;;  %v6236_v22 = vpop.f32.mrf.mxu0  ;;  %6439 = vmatmul.mubr.msk.f32.gmra.mxu1 %vm342_vm0, %v5547_v33  ;;  %6495 = vmatmul.mubr.msk.f32.gmra.mxu0 %vm342_vm0, %v5620_v14 }
 0x158   : > { %v7729_v54 = vadd.f32 %v2551_v38, %v2205_v39  ;;  %v2208_v17 = vadd.f32 %v6180_v51, %v7467_v23  ;;  %6441 = vmatprep.mubr.msk.f32.mxu1 %vm342_vm0, %v5548_v56  ;;  %6497 = vmatprep.mubr.msk.f32.mxu0 %vm342_vm0, %v5621_v12  ;;  %p6565_p0 = pneg %p6564_p13 }
 0x159   : > { %v2060_v30 = vpop.f32.mrf.mxu1  ;;  %v2561_v50 = vpop.f32.mrf.mxu0 }
 0x15a   : > { %v7736_v34 = vadd.f32 %v6236_v22, %v2208_v17  ;;  %v2207_v6 = vadd.f32 %v2060_v30, %v7473_v31  ;;  %p6572_p5 = pnand %p6571_p3, %p6565_p0 }
 0x15b   : > { %v6183_v18 = vpop.f32.mrf.mxu1  ;;  %v6239_v37 = vpop.f32.mrf.mxu0  ;;  %6442 = vmatmul.mubr.msk.f32.gmra.mxu1 %vm342_vm0, %v5549_v60  ;;  %6498 = vmatmul.mubr.msk.f32.gmra.mxu0 %vm342_vm0, %v5622_v57 }
 0x15c   : > { %v7741_v24 = vadd.f32 %v2561_v50, %v2207_v6  ;;  %v2210_v23 = vadd.f32 %v6183_v18, %v7483_v7 }
 0x15d   : > { %v2070_v45 = vpop.f32.mrf.mxu1  ;;  %v2571_v40 = vpop.f32.mrf.mxu0 }
 0x15e   : > { %v7744_v26 = vadd.f32 %v6239_v37, %v2210_v23  ;;  %v2209_v25 = vadd.f32 %v2070_v45, %v7489_v47 }
 0x15f   : > { %v6186_v11 = vpop.f32.mrf.mxu1  ;;  %v6242_v46 = vpop.f32.mrf.mxu0 }
 0x160   : > { %v7747_v10 = vadd.f32 %v2571_v40, %v2209_v25  ;;  %v2212_v31 = vadd.f32 %v6186_v11, %v7499_v13 }
 0x161   : > { %v2080_v35 = vpop.f32.mrf.mxu1  ;;  %v2581_v41 = vpop.f32.mrf.mxu0 }
 0x162   : > { %v7750_v33 = vadd.f32 %v6242_v46, %v2212_v31  ;;  %v2211_v14 = vadd.f32 %v2080_v35, %v7505_v62 }
 0x163   : > { %v6189_v16 = vpop.f32.mrf.mxu1  ;;  %v6245_v7 = vpop.f32.mrf.mxu0 }
 0x164   : > { %v7753_v38 = vadd.f32 %v2581_v41, %v2211_v14  ;;  %v2214_v56 = vadd.f32 %v6189_v16, %v7515_v21 }
 0x165   : > { %v2090_v12 = vpop.f32.mrf.mxu1  ;;  %v2591_v47 = vpop.f32.mrf.mxu0 }
 0x166   : > { %v7756_v39 = vadd.f32 %v6245_v7, %v2214_v56  ;;  %v2213_v51 = vadd.f32 %v2090_v12, %v7521_v3 }
 0x167   : > { %v6192_v22 = vpop.f32.mrf.mxu1  ;;  %v6248_v13 = vpop.f32.mrf.mxu0 }
 0x168   : > { %v7759_v17 = vadd.f32 %v2591_v47, %v2213_v51  ;;  %v2216_v60 = vadd.f32 %v6192_v22, %v7531_v29 }
 0x169   : > { %v2100_v57 = vpop.f32.mrf.mxu1  ;;  %v2601_v62 = vpop.f32.mrf.mxu0 }
 0x16a   : > { %v7762_v30 = vadd.f32 %v6248_v13, %v2216_v60  ;;  %v2215_v50 = vadd.f32 %v2100_v57, %v7537_v15 }
 0x16b   : > { %v6195_v6 = vpop.f32.mrf.mxu1  ;;  %v6251_v21 = vpop.f32.mrf.mxu0 }
 0x16c   : > { %v7765_v18 = vadd.f32 %v2601_v62, %v2215_v50  ;;  %v2218_v37 = vadd.f32 %v6195_v6, %v7547_v42 }
 0x16d   : > { %v2110_v23 = vpop.f32.mrf.mxu1  ;;  %v2611_v3 = vpop.f32.mrf.mxu0 }
 0x16e   : > { %v7768_v45 = vadd.f32 %v6251_v21, %v2218_v37  ;;  %v2217_v40 = vadd.f32 %v2110_v23, %v7553_v63 }
 0x16f   : > { %v6198_v25 = vpop.f32.mrf.mxu1  ;;  %v6254_v29 = vpop.f32.mrf.mxu0 }
 0x170   : > { %v7771_v11 = vadd.f32 %v2611_v3, %v2217_v40  ;;  %v2220_v46 = vadd.f32 %v6198_v25, %v7563_v53 }
 0x171   : > { %v2120_v31 = vpop.f32.mrf.mxu1  ;;  %v2621_v15 = vpop.f32.mrf.mxu0 }
 0x172   : > { %v7774_v35 = vadd.f32 %v6254_v29, %v2220_v46  ;;  %v2219_v41 = vadd.f32 %v2120_v31, %v7569_v44 }
 0x173   : > { %v6201_v14 = vpop.f32.mrf.mxu1  ;;  %v6257_v42 = vpop.f32.mrf.mxu0 }
 0x174   : > { %v7777_v16 = vadd.f32 %v2621_v15, %v2219_v41  ;;  %v2222_v7 = vadd.f32 %v6201_v14, %v7579_v1 }
 0x175   : > { %v2130_v56 = vpop.f32.mrf.mxu1  ;;  %v2631_v63 = vpop.f32.mrf.mxu0 }
 0x176   : > { %v7780_v12 = vadd.f32 %v6257_v42, %v2222_v7  ;;  %v2221_v47 = vadd.f32 %v2130_v56, %v7585_v32 }
 0x177   : > { %v6204_v51 = vpop.f32.mrf.mxu1  ;;  %v6260_v53 = vpop.f32.mrf.mxu0 }
 0x178   : > { %v7783_v22 = vadd.f32 %v2631_v63, %v2221_v47  ;;  %v2224_v13 = vadd.f32 %v6204_v51, %v7595_v52 }
 0x179   : > { %v2140_v60 = vpop.f32.mrf.mxu1  ;;  %v2641_v44 = vpop.f32.mrf.mxu0 }
 0x17a   : > { %v7786_v57 = vadd.f32 %v6260_v53, %v2224_v13  ;;  %v2223_v62 = vadd.f32 %v2140_v60, %v7601_v48 }
 0x17b   : > { %v6207_v50 = vpop.f32.mrf.mxu1  ;;  %v6263_v1 = vpop.f32.mrf.mxu0 }
 0x17c   : > { %v7789_v6 = vadd.f32 %v2641_v44, %v2223_v62  ;;  %v2226_v21 = vadd.f32 %v6207_v50, %v7611_v0 }
 0x17d   : > { %v2150_v37 = vpop.f32.mrf.mxu1  ;;  %v2651_v32 = vpop.f32.mrf.mxu0 }
 0x17e   : > { %v7792_v23 = vadd.f32 %v6263_v1, %v2226_v21  ;;  %v2225_v3 = vadd.f32 %v2150_v37, %v7617_v28 }
 0x17f   : > { %v6210_v40 = vpop.f32.mrf.mxu1  ;;  %v6266_v52 = vpop.f32.mrf.mxu0 }
 0x180   : > { %v7795_v25 = vadd.f32 %v2651_v32, %v2225_v3  ;;  %v2228_v29 = vadd.f32 %v6210_v40, %v7627_v8 }
 0x181   : > { %v2160_v46 = vpop.f32.mrf.mxu1  ;;  %v2661_v48 = vpop.f32.mrf.mxu0 }
 0x182   : > { %v7798_v31 = vadd.f32 %v6266_v52, %v2228_v29  ;;  %v2227_v15 = vadd.f32 %v2160_v46, %v7633_v49 }
 0x183   : > { %v6213_v41 = vpop.f32.mrf.mxu1  ;;  %v6269_v0 = vpop.f32.mrf.mxu0 }
 0x184   : > { %v7801_v14 = vadd.f32 %v2661_v48, %v2227_v15  ;;  %v2230_v42 = vadd.f32 %v6213_v41, %v7641_v2 }
 0x185   : > { %v2170_v7 = vpop.f32.mrf.mxu1  ;;  %v2671_v28 = vpop.f32.mrf.mxu0 }
 0x186   : > { %v7804_v56 = vadd.f32 %v6269_v0, %v2230_v42  ;;  %v2229_v63 = vadd.f32 %v2170_v7, %v7645_v59 }
 0x187   : > { %v6216_v47 = vpop.f32.mrf.mxu1  ;;  %v6272_v8 = vpop.f32.mrf.mxu0 }
 0x188   : > { %v7807_v51 = vadd.f32 %v2671_v28, %v2229_v63  ;;  %v2232_v53 = vadd.f32 %v6216_v47, %v7654_v5 }
 0x189   : > { %v2180_v13 = vpop.f32.mrf.mxu1  ;;  %v2681_v49 = vpop.f32.mrf.mxu0 }
 0x18a   : > { %v7810_v60 = vadd.f32 %v6272_v8, %v2232_v53  ;;  %v2231_v44 = vadd.f32 %v2180_v13, %v7659_v4 }
 0x18b   : > { %v6219_v62 = vpop.f32.mrf.mxu1  ;;  %v6275_v2 = vpop.f32.mrf.mxu0 }
 0x18c   : > { %v7813_v50 = vadd.f32 %v2681_v49, %v2231_v44  ;;  %v2234_v1 = vadd.f32 %v6219_v62, %v7668_v43 }
 0x18d   : > { %v2190_v21 = vpop.f32.mrf.mxu1  ;;  %v2691_v59 = vpop.f32.mrf.mxu0 }
 0x18e   : > { %v7816_v37 = vadd.f32 %v6275_v2, %v2234_v1  ;;  %v2233_v32 = vadd.f32 %v2190_v21, %v7673_v55 }
 0x18f   : > { %v6280_v3 = vpop.f32.mrf.mxu1  ;;  %v6336_v5 = vpop.f32.mrf.mxu0 }
 0x190   : > { %v7819_v40 = vadd.f32 %v2691_v59, %v2233_v32  ;;  %v3202_v52 = vadd.f32 %v6280_v3, %v7682_v9 }
 0x191   : > { %v3022_v29 = vpop.f32.mrf.mxu1  ;;  %v3523_v4 = vpop.f32.mrf.mxu0 }
 0x192   : > { %v7822_v46 = vadd.f32 %v6336_v5, %v3202_v52  ;;  %v3201_v48 = vadd.f32 %v3022_v29, %v7687_v20 }
 0x193   : > { %v6283_v15 = vpop.f32.mrf.mxu1  ;;  %v6339_v43 = vpop.f32.mrf.mxu0 }
 0x194   : > { %v7825_v41 = vadd.f32 %v3523_v4, %v3201_v48  ;;  %v3204_v0 = vadd.f32 %v6283_v15, %v7696_v19 }
 0x195   : > { %v3032_v42 = vpop.f32.mrf.mxu1  ;;  %v3533_v55 = vpop.f32.mrf.mxu0 }
 0x196   : > { %v7828_v7 = vadd.f32 %v6339_v43, %v3204_v0  ;;  %v3203_v28 = vadd.f32 %v3032_v42, %v7701_v36 }
 0x197   : > { %v6286_v63 = vpop.f32.mrf.mxu1  ;;  %v6342_v9 = vpop.f32.mrf.mxu0 }
 0x198   : > { %v7831_v47 = vadd.f32 %v3533_v55, %v3203_v28  ;;  %v3206_v8 = vadd.f32 %v6286_v63, %v7710_v27 }
 0x199   : > { %v3042_v53 = vpop.f32.mrf.mxu1  ;;  %v3543_v20 = vpop.f32.mrf.mxu0 }
 0x19a   : > { %v7834_v13 = vadd.f32 %v6342_v9, %v3206_v8  ;;  %v3205_v49 = vadd.f32 %v3042_v53, %v7715_v58 }
 0x19b   : > { %v6289_v44 = vpop.f32.mrf.mxu1  ;;  %v6345_v19 = vpop.f32.mrf.mxu0 }
 0x19c   : > { %v7837_v62 = vadd.f32 %v3543_v20, %v3205_v49  ;;  %v3208_v2 = vadd.f32 %v6289_v44, %v7724_v61 }
 0x19d   : > { %v3052_v1 = vpop.f32.mrf.mxu1  ;;  %v3553_v36 = vpop.f32.mrf.mxu0 }
 0x19e   : > { %v7840_v21 = vadd.f32 %v6345_v19, %v3208_v2  ;;  %v3207_v59 = vadd.f32 %v3052_v1, %v7729_v54 }
 0x19f   : > { %v6292_v32 = vpop.f32.mrf.mxu1  ;;  %v6348_v27 = vpop.f32.mrf.mxu0 }
 0x1a0   : > { %v7843_v3 = vadd.f32 %v3553_v36, %v3207_v59  ;;  %v3210_v5 = vadd.f32 %v6292_v32, %v7736_v34 }
 0x1a1   : > { %v3062_v52 = vpop.f32.mrf.mxu1  ;;  %v3563_v58 = vpop.f32.mrf.mxu0 }
 0x1a2   : > { %v7846_v29 = vadd.f32 %v6348_v27, %v3210_v5  ;;  %v3209_v4 = vadd.f32 %v3062_v52, %v7741_v24 }
 0x1a3   : > { %v6295_v48 = vpop.f32.mrf.mxu1  ;;  %v6351_v61 = vpop.f32.mrf.mxu0 }
 0x1a4   : > { %v7849_v15 = vadd.f32 %v3563_v58, %v3209_v4  ;;  %v3212_v43 = vadd.f32 %v6295_v48, %v7744_v26 }
 0x1a5   : > { %v3072_v0 = vpop.f32.mrf.mxu1  ;;  %v3573_v54 = vpop.f32.mrf.mxu0 }
 0x1a6   : > { %v7852_v42 = vadd.f32 %v6351_v61, %v3212_v43  ;;  %v3211_v55 = vadd.f32 %v3072_v0, %v7747_v10 }
 0x1a7   : > { %v6298_v28 = vpop.f32.mrf.mxu1  ;;  %v6354_v34 = vpop.f32.mrf.mxu0 }
 0x1a8   : > { %v7855_v63 = vadd.f32 %v3573_v54, %v3211_v55  ;;  %v3214_v9 = vadd.f32 %v6298_v28, %v7750_v33 }
 0x1a9   : > { %v3082_v8 = vpop.f32.mrf.mxu1  ;;  %v3583_v24 = vpop.f32.mrf.mxu0 }
 0x1aa   : > { %v7858_v53 = vadd.f32 %v6354_v34, %v3214_v9  ;;  %v3213_v20 = vadd.f32 %v3082_v8, %v7753_v38 }
 0x1ab   : > { %v6301_v49 = vpop.f32.mrf.mxu1  ;;  %v6357_v26 = vpop.f32.mrf.mxu0 }
 0x1ac   : > { %v7861_v44 = vadd.f32 %v3583_v24, %v3213_v20  ;;  %v3216_v19 = vadd.f32 %v6301_v49, %v7756_v39 }
 0x1ad   : > { %v3092_v2 = vpop.f32.mrf.mxu1  ;;  %v3593_v10 = vpop.f32.mrf.mxu0 }
 0x1ae   : > { %v7864_v1 = vadd.f32 %v6357_v26, %v3216_v19  ;;  %v3215_v36 = vadd.f32 %v3092_v2, %v7759_v17 }
 0x1af   : > { %v6304_v59 = vpop.f32.mrf.mxu1  ;;  %v6360_v33 = vpop.f32.mrf.mxu0 }
 0x1b0   : > { %v7867_v32 = vadd.f32 %v3593_v10, %v3215_v36  ;;  %v3218_v27 = vadd.f32 %v6304_v59, %v7762_v30 }
 0x1b1   : > { %v3102_v5 = vpop.f32.mrf.mxu1  ;;  %v3603_v38 = vpop.f32.mrf.mxu0 }
 0x1b2   : > { %v7870_v52 = vadd.f32 %v6360_v33, %v3218_v27  ;;  %v3217_v58 = vadd.f32 %v3102_v5, %v7765_v18 }
 0x1b3   : > { %v6307_v4 = vpop.f32.mrf.mxu1  ;;  %v6363_v39 = vpop.f32.mrf.mxu0 }
 0x1b4   : > { %v7873_v48 = vadd.f32 %v3603_v38, %v3217_v58  ;;  %v3220_v61 = vadd.f32 %v6307_v4, %v7768_v45 }
 0x1b5   : > { %v3112_v43 = vpop.f32.mrf.mxu1  ;;  %v3613_v17 = vpop.f32.mrf.mxu0 }
 0x1b6   : > { %v7876_v0 = vadd.f32 %v6363_v39, %v3220_v61  ;;  %v3219_v54 = vadd.f32 %v3112_v43, %v7771_v11 }
 0x1b7   : > { %v6310_v55 = vpop.f32.mrf.mxu1  ;;  %v6366_v30 = vpop.f32.mrf.mxu0 }
 0x1b8   : > { %v7879_v28 = vadd.f32 %v3613_v17, %v3219_v54  ;;  %v3222_v34 = vadd.f32 %v6310_v55, %v7774_v35 }
 0x1b9   : > { %v3122_v9 = vpop.f32.mrf.mxu1  ;;  %v3623_v18 = vpop.f32.mrf.mxu0 }
 0x1ba   : > { %v7882_v8 = vadd.f32 %v6366_v30, %v3222_v34  ;;  %v3221_v24 = vadd.f32 %v3122_v9, %v7777_v16 }
 0x1bb   : > { %v6313_v20 = vpop.f32.mrf.mxu1  ;;  %v6369_v45 = vpop.f32.mrf.mxu0 }
 0x1bc   : > { %v7885_v49 = vadd.f32 %v3623_v18, %v3221_v24  ;;  %v3224_v26 = vadd.f32 %v6313_v20, %v7780_v12 }
 0x1bd   : > { %v3132_v19 = vpop.f32.mrf.mxu1  ;;  %v3633_v11 = vpop.f32.mrf.mxu0 }
 0x1be   : > { %v7888_v2 = vadd.f32 %v6369_v45, %v3224_v26  ;;  %v3223_v10 = vadd.f32 %v3132_v19, %v7783_v22 }
 0x1bf   : > { %v6316_v36 = vpop.f32.mrf.mxu1  ;;  %v6372_v35 = vpop.f32.mrf.mxu0 }
 0x1c0   : > { %v7891_v59 = vadd.f32 %v3633_v11, %v3223_v10  ;;  %v3226_v33 = vadd.f32 %v6316_v36, %v7786_v57 }
 0x1c1   : > { %v3142_v27 = vpop.f32.mrf.mxu1  ;;  %v3643_v16 = vpop.f32.mrf.mxu0 }
 0x1c2   : > { %v7894_v5 = vadd.f32 %v6372_v35, %v3226_v33  ;;  %v3225_v38 = vadd.f32 %v3142_v27, %v7789_v6 }
 0x1c3   : > { %v6319_v58 = vpop.f32.mrf.mxu1  ;;  %v6375_v12 = vpop.f32.mrf.mxu0 }
 0x1c4   : > { %v7897_v4 = vadd.f32 %v3643_v16, %v3225_v38  ;;  %v3228_v39 = vadd.f32 %v6319_v58, %v7792_v23 }
 0x1c5   : > { %v3152_v61 = vpop.f32.mrf.mxu1  ;;  %v3653_v22 = vpop.f32.mrf.mxu0 }
 0x1c6   : > { %v7900_v43 = vadd.f32 %v6375_v12, %v3228_v39  ;;  %v3227_v17 = vadd.f32 %v3152_v61, %v7795_v25 }
 0x1c7   : > { %v6322_v54 = vpop.f32.mrf.mxu1  ;;  %v6378_v57 = vpop.f32.mrf.mxu0 }
 0x1c8   : > { %v7903_v55 = vadd.f32 %v3653_v22, %v3227_v17  ;;  %v3230_v30 = vadd.f32 %v6322_v54, %v7798_v31 }
 0x1c9   : > { %v3162_v34 = vpop.f32.mrf.mxu1  ;;  %v3663_v6 = vpop.f32.mrf.mxu0 }
 0x1ca   : > { %v7906_v9 = vadd.f32 %v6378_v57, %v3230_v30  ;;  %v3229_v18 = vadd.f32 %v3162_v34, %v7801_v14 }
 0x1cb   : > { %v6325_v24 = vpop.f32.mrf.mxu1  ;;  %v6381_v23 = vpop.f32.mrf.mxu0 }
 0x1cc   : > { %v7909_v20 = vadd.f32 %v3663_v6, %v3229_v18  ;;  %v3232_v45 = vadd.f32 %v6325_v24, %v7804_v56 }
 0x1cd   : > { %v3172_v26 = vpop.f32.mrf.mxu1  ;;  %v3673_v25 = vpop.f32.mrf.mxu0 }
 0x1ce   : > { %v7912_v19 = vadd.f32 %v6381_v23, %v3232_v45  ;;  %v3231_v11 = vadd.f32 %v3172_v26, %v7807_v51 }
 0x1cf   : > { %v6328_v31 = vpop.f32.mrf.mxu1  ;;  %v6384_v10 = vpop.f32.mrf.mxu0 }
 0x1d0   : > { %v7915_v36 = vadd.f32 %v3673_v25, %v3231_v11  ;;  %v3234_v14 = vadd.f32 %v6328_v31, %v7810_v60 }
 0x1d1   : > { %v3182_v35 = vpop.f32.mrf.mxu1  ;;  %v3683_v33 = vpop.f32.mrf.mxu0 }
 0x1d2   : > { %v7918_v27 = vadd.f32 %v6384_v10, %v3234_v14  ;;  %v3233_v56 = vadd.f32 %v3182_v35, %v7813_v50 }
 0x1d3   : > { %v6331_v16 = vpop.f32.mrf.mxu1  ;;  %v6387_v38 = vpop.f32.mrf.mxu0 }
 0x1d4   : > { %v7921_v58 = vadd.f32 %v3683_v33, %v3233_v56  ;;  %v3236_v12 = vadd.f32 %v6331_v16, %v7816_v37 }
 0x1d5   : > { %v3192_v51 = vpop.f32.mrf.mxu1  ;;  %v3693_v39 = vpop.f32.mrf.mxu0 }
 0x1d6   : > { %v7925_v61 = vadd.f32 %v6387_v38, %v3236_v12  ;;  %v3235_v22 = vadd.f32 %v3192_v51, %v7819_v40 }
 0x1d7   : > { %v6392_v60 = vpop.f32.mrf.mxu1  ;;  %v6448_v17 = vpop.f32.mrf.mxu0 }
 0x1d8   : > { %v7930_v54 = vadd.f32 %v3693_v39, %v3235_v22  ;;  %v4204_v50 = vadd.f32 %v6392_v60, %v7822_v46 }
 0x1d9   : > { %v4024_v57 = vpop.f32.mrf.mxu1  ;;  %v4525_v30 = vpop.f32.mrf.mxu0 }
 0x1da   : > { %v4705_v34 = vadd.f32 %v6448_v17, %v4204_v50  ;;  %v4203_v37 = vadd.f32 %v4024_v57, %v7825_v41 }
 0x1db   : > { %v6395_v6 = vpop.f32.mrf.mxu1  ;;  %v6451_v18 = vpop.f32.mrf.mxu0 }
 0x1dc   : > { %v4813_v24 = vmax.f32 %v4705_v34, 0.0  ;;  %v4704_v23 = vadd.f32 %v4525_v30, %v4203_v37  ;;  %v4206_v45 = vadd.f32 %v6395_v6, %v7828_v7 }
 0x1dd   : > { %v4034_v40 = vpop.f32.mrf.mxu1  ;;  %v4535_v26 = vpop.f32.mrf.mxu0 }
 0x1de   : > { %4849 = vst [vmem:[%s7935_s9 + $0x8] sm:$0xff] %v4813_v24  ;;  %v4812_v46 = vmax.f32 %v4704_v23, 0.0  ;;  %v4707_v25 = vadd.f32 %v6451_v18, %v4206_v45  ;;  %v4205_v11 = vadd.f32 %v4034_v40, %v7831_v47 }
 0x1df   : > { %v6398_v41 = vpop.f32.mrf.mxu1  ;;  %v6454_v31 = vpop.f32.mrf.mxu0 }
 0x1e0   : > { %4848 = vst [vmem:[%s7935_s9] sm:$0xff] %v4812_v46  ;;  %v4815_v10 = vmax.f32 %v4707_v25, 0.0  ;;  %v4706_v14 = vadd.f32 %v4535_v26, %v4205_v11  ;;  %v4208_v7 = vadd.f32 %v6398_v41, %v7834_v13 }
 0x1e1   : > { %v4044_v35 = vpop.f32.mrf.mxu1  ;;  %v4545_v33 = vpop.f32.mrf.mxu0 }
 0x1e2   : > { %4851 = vst [vmem:[%s7935_s9 + $0x18] sm:$0xff] %v4815_v10  ;;  %v4814_v56 = vmax.f32 %v4706_v14, 0.0  ;;  %v4709_v16 = vadd.f32 %v6454_v31, %v4208_v7  ;;  %v4207_v38 = vadd.f32 %v4044_v35, %v7837_v62 }
 0x1e3   : > { %v6401_v12 = vpop.f32.mrf.mxu1  ;;  %v6457_v51 = vpop.f32.mrf.mxu0 }
 0x1e4   : > { %4850 = vst [vmem:[%s7935_s9 + $0x10] sm:$0xff] %v4814_v56  ;;  %v4817_v47 = vmax.f32 %v4709_v16, 0.0  ;;  %v4708_v39 = vadd.f32 %v4545_v33, %v4207_v38  ;;  %v4210_v22 = vadd.f32 %v6401_v12, %v7840_v21 }
 0x1e5   : > { %v4054_v60 = vpop.f32.mrf.mxu1  ;;  %v4555_v17 = vpop.f32.mrf.mxu0 }
 0x1e6   : > { %4853 = vst [vmem:[%s7935_s9 + $0x28] sm:$0xff] %v4817_v47  ;;  %v4816_v13 = vmax.f32 %v4708_v39, 0.0  ;;  %v4711_v50 = vadd.f32 %v6457_v51, %v4210_v22  ;;  %v4209_v57 = vadd.f32 %v4054_v60, %v7843_v3 }
 0x1e7   : > { %v6404_v30 = vpop.f32.mrf.mxu1  ;;  %v6460_v34 = vpop.f32.mrf.mxu0 }
 0x1e8   : > { %4852 = vst [vmem:[%s7935_s9 + $0x20] sm:$0xff] %v4816_v13  ;;  %v4819_v62 = vmax.f32 %v4711_v50, 0.0  ;;  %v4710_v37 = vadd.f32 %v4555_v17, %v4209_v57  ;;  %v4212_v6 = vadd.f32 %v6404_v30, %v7846_v29 }
 0x1e9   : > { %v4064_v18 = vpop.f32.mrf.mxu1  ;;  %v4565_v24 = vpop.f32.mrf.mxu0 }
 0x1ea   : > { %4855 = vst [vmem:[%s7935_s9 + $0x38] sm:$0xff] %v4819_v62  ;;  %v4818_v21 = vmax.f32 %v4710_v37, 0.0  ;;  %v4713_v23 = vadd.f32 %v6460_v34, %v4212_v6  ;;  %v4211_v45 = vadd.f32 %v4064_v18, %v7849_v15 }
 0x1eb   : > { %v6407_v40 = vpop.f32.mrf.mxu1  ;;  %v6463_v26 = vpop.f32.mrf.mxu0 }
 0x1ec   : > { %4854 = vst [vmem:[%s7935_s9 + $0x30] sm:$0xff] %v4818_v21  ;;  %v4821_v3 = vmax.f32 %v4713_v23, 0.0  ;;  %v4712_v46 = vadd.f32 %v4565_v24, %v4211_v45  ;;  %v4214_v25 = vadd.f32 %v6407_v40, %v7852_v42 }
 0x1ed   : > { %v4074_v11 = vpop.f32.mrf.mxu1  ;;  %v4575_v41 = vpop.f32.mrf.mxu0 }
 0x1ee   : > { %4857 = vst [vmem:[%s7935_s9 + $0x48] sm:$0xff] %v4821_v3  ;;  %v4820_v29 = vmax.f32 %v4712_v46, 0.0  ;;  %v4715_v31 = vadd.f32 %v6463_v26, %v4214_v25  ;;  %v4213_v10 = vadd.f32 %v4074_v11, %v7855_v63 }
 0x1ef   : > { %v6410_v14 = vpop.f32.mrf.mxu1  ;;  %v6466_v7 = vpop.f32.mrf.mxu0 }
 0x1f0   : > { %4856 = vst [vmem:[%s7935_s9 + $0x40] sm:$0xff] %v4820_v29  ;;  %v4823_v15 = vmax.f32 %v4715_v31, 0.0  ;;  %v4714_v35 = vadd.f32 %v4575_v41, %v4213_v10  ;;  %v4216_v33 = vadd.f32 %v6410_v14, %v7858_v53 }
 0x1f1   : > { %v4084_v56 = vpop.f32.mrf.mxu1  ;;  %v4585_v16 = vpop.f32.mrf.mxu0 }
 0x1f2   : > { %4859 = vst [vmem:[%s7935_s9 + $0x58] sm:$0xff] %v4823_v15  ;;  %v4822_v42 = vmax.f32 %v4714_v35, 0.0  ;;  %v4717_v38 = vadd.f32 %v6466_v7, %v4216_v33  ;;  %v4215_v12 = vadd.f32 %v4084_v56, %v7861_v44 }
 0x1f3   : > { %v6413_v51 = vpop.f32.mrf.mxu1  ;;  %v6469_v47 = vpop.f32.mrf.mxu0 }
 0x1f4   : > { %4858 = vst [vmem:[%s7935_s9 + $0x50] sm:$0xff] %v4822_v42  ;;  %v4825_v63 = vmax.f32 %v4717_v38, 0.0  ;;  %v4716_v39 = vadd.f32 %v4585_v16, %v4215_v12  ;;  %v4218_v22 = vadd.f32 %v6413_v51, %v7864_v1 }
 0x1f5   : > { %v4094_v60 = vpop.f32.mrf.mxu1  ;;  %v4595_v17 = vpop.f32.mrf.mxu0 }
 0x1f6   : > { %4861 = vst [vmem:[%s7935_s9 + $0x68] sm:$0xff] %v4825_v63  ;;  %v4824_v53 = vmax.f32 %v4716_v39, 0.0  ;;  %v4719_v13 = vadd.f32 %v6469_v47, %v4218_v22  ;;  %v4217_v50 = vadd.f32 %v4094_v60, %v7867_v32 }
 0x1f7   : > { %v6416_v57 = vpop.f32.mrf.mxu1  ;;  %v6472_v30 = vpop.f32.mrf.mxu0 }
 0x1f8   : > { %4860 = vst [vmem:[%s7935_s9 + $0x60] sm:$0xff] %v4824_v53  ;;  %v4827_v44 = vmax.f32 %v4719_v13, 0.0  ;;  %v4718_v34 = vadd.f32 %v4595_v17, %v4217_v50  ;;  %v4220_v62 = vadd.f32 %v6416_v57, %v7870_v52 }
 0x1f9   : > { %v4104_v37 = vpop.f32.mrf.mxu1  ;;  %v4605_v6 = vpop.f32.mrf.mxu0 }
 0x1fa   : > { %4863 = vst [vmem:[%s7935_s9 + $0x78] sm:$0xff] %v4827_v44  ;;  %v4826_v1 = vmax.f32 %v4718_v34, 0.0  ;;  %v4721_v18 = vadd.f32 %v6472_v30, %v4220_v62  ;;  %v4219_v24 = vadd.f32 %v4104_v37, %v7873_v48 }
 0x1fb   : > { %v6419_v21 = vpop.f32.mrf.mxu1  ;;  %v6475_v23 = vpop.f32.mrf.mxu0 }
 0x1fc   : > { %4862 = vst [vmem:[%s7935_s9 + $0x70] sm:$0xff] %v4826_v1  ;;  %v4829_v32 = vmax.f32 %v4721_v18, 0.0  ;;  %v4720_v45 = vadd.f32 %v4605_v6, %v4219_v24  ;;  %v4222_v40 = vadd.f32 %v6419_v21, %v7876_v0 }
 0x1fd   : > { %v4114_v26 = vpop.f32.mrf.mxu1  ;;  %v4615_v3 = vpop.f32.mrf.mxu0 }
 0x1fe   : > { %4865 = vst [vmem:[%s7935_s9 + $0x88] sm:$0xff] %v4829_v32  ;;  %v4828_v52 = vmax.f32 %v4720_v45, 0.0  ;;  %v4723_v46 = vadd.f32 %v6475_v23, %v4222_v40  ;;  %v4221_v25 = vadd.f32 %v4114_v26, %v7879_v28 }
 0x1ff   : > { %v6422_v11 = vpop.f32.mrf.mxu1  ;;  %v6478_v41 = vpop.f32.mrf.mxu0 }
 0x200   : > { %4864 = vst [vmem:[%s7935_s9 + $0x80] sm:$0xff] %v4828_v52  ;;  %v4831_v48 = vmax.f32 %v4723_v46, 0.0  ;;  %v4722_v29 = vadd.f32 %v4615_v3, %v4221_v25  ;;  %v4224_v31 = vadd.f32 %v6422_v11, %v7882_v8 }
 0x201   : > { %v4124_v10 = vpop.f32.mrf.mxu1  ;;  %v4625_v14 = vpop.f32.mrf.mxu0 }
 0x202   : > { %4867 = vst [vmem:[%s7935_s9 + $0x98] sm:$0xff] %v4831_v48  ;;  %v4830_v0 = vmax.f32 %v4722_v29, 0.0  ;;  %v4725_v7 = vadd.f32 %v6478_v41, %v4224_v31  ;;  %v4223_v15 = vadd.f32 %v4124_v10, %v7885_v49 }
 0x203   : > { %v6425_v35 = vpop.f32.mrf.mxu1  ;;  %v6481_v33 = vpop.f32.mrf.mxu0 }
 0x204   : > { %4866 = vst [vmem:[%s7935_s9 + $0x90] sm:$0xff] %v4830_v0  ;;  %v4833_v28 = vmax.f32 %v4725_v7, 0.0  ;;  %v4724_v56 = vadd.f32 %v4625_v14, %v4223_v15  ;;  %v4226_v16 = vadd.f32 %v6425_v35, %v7888_v2 }
 0x205   : > { %v4134_v42 = vpop.f32.mrf.mxu1  ;;  %v4635_v38 = vpop.f32.mrf.mxu0 }
 0x206   : > { %4869 = vst [vmem:[%s7935_s9 + $0xa8] sm:$0xff] %v4833_v28  ;;  %v4832_v8 = vmax.f32 %v4724_v56, 0.0  ;;  %v4727_v12 = vadd.f32 %v6481_v33, %v4226_v16  ;;  %v4225_v51 = vadd.f32 %v4134_v42, %v7891_v59 }
 0x207   : > { %v6428_v47 = vpop.f32.mrf.mxu1  ;;  %v6484_v63 = vpop.f32.mrf.mxu0 }
 0x208   : > { %4868 = vst [vmem:[%s7935_s9 + $0xa0] sm:$0xff] %v4832_v8  ;;  %v4835_v49 = vmax.f32 %v4727_v12, 0.0  ;;  %v4726_v39 = vadd.f32 %v4635_v38, %v4225_v51  ;;  %v4228_v22 = vadd.f32 %v6428_v47, %v7894_v5 }
 0x209   : > { %v4144_v60 = vpop.f32.mrf.mxu1  ;;  %v4645_v17 = vpop.f32.mrf.mxu0 }
 0x20a   : > { %4871 = vst [vmem:[%s7935_s9 + $0xb8] sm:$0xff] %v4835_v49  ;;  %v4834_v2 = vmax.f32 %v4726_v39, 0.0  ;;  %v4729_v53 = vadd.f32 %v6484_v63, %v4228_v22  ;;  %v4227_v13 = vadd.f32 %v4144_v60, %v7897_v4 }
 0x20b   : > { %v6431_v50 = vpop.f32.mrf.mxu1  ;;  %v6487_v57 = vpop.f32.mrf.mxu0 }
 0x20c   : > { %4870 = vst [vmem:[%s7935_s9 + $0xb0] sm:$0xff] %v4834_v2  ;;  %v4837_v59 = vmax.f32 %v4729_v53, 0.0  ;;  %v4728_v30 = vadd.f32 %v4645_v17, %v4227_v13  ;;  %v4230_v44 = vadd.f32 %v6431_v50, %v7900_v43 }
 0x20d   : > { %v4154_v34 = vpop.f32.mrf.mxu1  ;;  %v4655_v62 = vpop.f32.mrf.mxu0 }
 0x20e   : > { %4873 = vst [vmem:[%s7935_s9 + $0xc8] sm:$0xff] %v4837_v59  ;;  %v4836_v5 = vmax.f32 %v4728_v30, 0.0  ;;  %v4731_v37 = vadd.f32 %v6487_v57, %v4230_v44  ;;  %v4229_v6 = vadd.f32 %v4154_v34, %v7903_v55 }
 0x20f   : > { %v6434_v1 = vpop.f32.mrf.mxu1  ;;  %v6490_v18 = vpop.f32.mrf.mxu0 }
 0x210   : > { %4872 = vst [vmem:[%s7935_s9 + $0xc0] sm:$0xff] %v4836_v5  ;;  %v4839_v4 = vmax.f32 %v4731_v37, 0.0  ;;  %v4730_v24 = vadd.f32 %v4655_v62, %v4229_v6  ;;  %v4232_v21 = vadd.f32 %v6434_v1, %v7906_v9 }
 0x211   : > { %v4164_v23 = vpop.f32.mrf.mxu1  ;;  %v4665_v32 = vpop.f32.mrf.mxu0 }
 0x212   : > { %4875 = vst [vmem:[%s7935_s9 + $0xd8] sm:$0xff] %v4839_v4  ;;  %v4838_v43 = vmax.f32 %v4730_v24, 0.0  ;;  %v4733_v45 = vadd.f32 %v6490_v18, %v4232_v21  ;;  %v4231_v40 = vadd.f32 %v4164_v23, %v7909_v20 }
 0x213   : > { %v6437_v26 = vpop.f32.mrf.mxu1  ;;  %v6493_v3 = vpop.f32.mrf.mxu0 }
 0x214   : > { %4874 = vst [vmem:[%s7935_s9 + $0xd0] sm:$0xff] %v4838_v43  ;;  %v4841_v55 = vmax.f32 %v4733_v45, 0.0  ;;  %v4732_v52 = vadd.f32 %v4665_v32, %v4231_v40  ;;  %v4234_v46 = vadd.f32 %v6437_v26, %v7912_v19 }
 0x215   : > { %v4174_v25 = vpop.f32.mrf.mxu1  ;;  %v4675_v11 = vpop.f32.mrf.mxu0 }
 0x216   : > { %4877 = vst [vmem:[%s7935_s9 + $0xe8] sm:$0xff] %v4841_v55  ;;  %v4840_v9 = vmax.f32 %v4732_v52, 0.0  ;;  %v4735_v41 = vadd.f32 %v6493_v3, %v4234_v46  ;;  %v4233_v48 = vadd.f32 %v4174_v25, %v7915_v36 }
 0x217   : > { %v6440_v29 = vpop.f32.mrf.mxu1  ;;  %v6496_v31 = vpop.f32.mrf.mxu0 }
 0x218   : > { %4876 = vst [vmem:[%s7935_s9 + $0xe0] sm:$0xff] %v4840_v9  ;;  %v4843_v20 = vmax.f32 %v4735_v41, 0.0  ;;  %v4734_v10 = vadd.f32 %v4675_v11, %v4233_v48  ;;  %v4236_v14 = vadd.f32 %v6440_v29, %v7918_v27 }
 0x219   : > { %v4184_v0 = vpop.f32.mrf.mxu1  ;;  %v4685_v7 = vpop.f32.mrf.mxu0 }
 0x21a   : > { %4879 = vst [vmem:[%s7935_s9 + $0xf8] sm:$0xff] %v4843_v20  ;;  %v4842_v19 = vmax.f32 %v4734_v10, 0.0  ;;  %v4737_v15 = vadd.f32 %v6496_v31, %v4236_v14  ;;  %v4235_v35 = vadd.f32 %v4184_v0, %v7921_v58 }
 0x21b   : > { %v6443_v33 = vpop.f32.mrf.mxu1  ;;  %v6499_v36 = vpop.f32.mrf.mxu0 }
 0x21c   : > { %4878 = vst [vmem:[%s7935_s9 + $0xf0] sm:$0xff] %v4842_v19  ;;  %v4845_v28 = vmax.f32 %v4737_v15, 0.0  ;;  %v4736_v56 = vadd.f32 %v4685_v7, %v4235_v35  ;;  %v4238_v16 = vadd.f32 %v6443_v33, %v7925_v61 }
 0x21d   : > { %v4194_v42 = vpop.f32.mrf.mxu1  ;;  %v4695_v58 = vpop.f32.mrf.mxu0 }
 0x21e   : > { %4881 = vst [vmem:[%s7935_s9 + $0x108] sm:$0xff] %v4845_v28  ;;  %v4844_v27 = vmax.f32 %v4736_v56, 0.0  ;;  %v4739_v38 = vadd.f32 %v6499_v36, %v4238_v16  ;;  %v4237_v8 = vadd.f32 %v4194_v42, %v7930_v54 }
 0x220   : > { %4880 = vst [vmem:[%s7935_s9 + $0x100] sm:$0xff] %v4844_v27  ;;  %v4847_v12 = vmax.f32 %v4739_v38, 0.0  ;;  %v4738_v51 = vadd.f32 %v4695_v58, %v4237_v8 }
 0x222   : > { %4883 = vst [vmem:[%s7935_s9 + $0x118] sm:$0xff] %v4847_v12  ;;  %v4846_v61 = vmax.f32 %v4738_v51, 0.0 }
 0x224   : > { %4882 = vst [vmem:[%s7935_s9 + $0x110] sm:$0xff] %v4846_v61 }
 0x225   : > { %6575 = shalt.err (!%p6572_p5)
}
 0x226   : > { %s6576_s29 = scalar_lea.hbm %s8009_s21, 4608  ;;  %s6580_s5 = scalar_lea.hbm %s8065_s3, 9216 }
 0x227   : > { %p6577_p6 = scmp.ne.s32.totalorder %s8009_s21, %s6576_s29  ;;  %p6581_p10 = scmp.lt.s32.totalorder %s8009_s21, %s8065_s3 }
 0x228   : > { %p6582_p11 = scmp.lt.s32.totalorder %s6580_s5, %s6576_s29 }
 0x229   : > { %p6578_p7 = pnand %p6577_p6, %p6703_p4 }
 0x22a   : > { %p6583_p12 = por %p6582_p11, %p6581_p10 }
 0x22b   : > { %p6579_p9 = pneg %p6578_p7 }
 0x22d   : > { %p6584_p13 = pnand %p6583_p12, %p6579_p9 }
 0x22f   : > { %6587 = shalt.err (!%p6584_p13)
}
 0x230   : > { %s6641_s8 = smov 128   ;;  %s6642_s9 = smov 8  }
 0x231   : > { %6505 = dma.vmem_to_hbm [thread:$0]  (%p6703_p4), %s8011_s11, 4608, %s8009_s21, %s8017_s15, %s6641_s8, %s6641_s8, %s6642_s9  }
 0x232 PF: > { %p6511_p0 = scmp.ge.s32.totalorder %s6638_s17, 2  ;;  %s4916_s10 = sand.u32 1, %s6618_s12  }
 0x233   : > { %s4917_s18 = scalar_lea.sflag [#allocation4], %s4916_s10 }
 0x234   : > { %p6508_p1 = pnand %p6511_p0, %p6710_p8 }
 0x236   : > { %p6509_p2 = pneg %p6508_p1 }
 0x238   : > { %6613 = dma.done.wait (%p6509_p2), %s4917_s18, 4608  }
 0x239   : > { %6615 = vsyncadd (%p6509_p2), %s4917_s18, 4294962688  ;;  %s16_s17 = sadd.s32 1, %s6638_s17   ;;  %s8068_s12 = smov %s6622_s13 }
 0x23a   : > { %p13_p3 = scmp.ge.s32.totalorder %s16_s17, 4   ;;  %s8069_s13 = smov %s6626_s14 }
 0x23b   : > { %s8070_s14 = smov %s6716_s25  ;;  %s8071_s15 = smov %s6634_s16 }
 0x23c   : > { %s8072_s16 = smov %s8074_s20  ;;  %15 = sbr.rel (!%p13_p3) target bundleno = 4 (0x4), region = 90 }
 0x241   :  { %4922 = vsyncpa [#allocation4], 1 }
 0x242   :  { %4924 = vsyncpa [#allocation4 + $0x1], 1 }

</bundles_post_ra>
